<compile_context>
chip_gen: v7x
topology: tpu7x:2x2x1
jax: 0.10.0
libtpu: 0.0.40
codegen_flags: <defaults>
</compile_context>

<pallas_src>
import jax
import jax.numpy as jnp
import numpy as np
from jax.experimental import pallas as pl
from jax.experimental.pallas import tpu as pltpu


def att_kernel(x_ref, xpad_ref, g_ref, o_ref):
    # x_ref:    (C, N)  interior features -> 1x1 conv kernels (one per pixel)
    # xpad_ref: (C, TP) padded features for this position tile
    # g_ref:    (N, TP) gate scores for this position tile
    # o_ref:    (C, TP) output tile (padded-position layout; cropped outside)
    x = x_ref[...].astype(jnp.float32)
    xp = xpad_ref[...].astype(jnp.float32)
    g = g_ref[...].astype(jnp.float32)

    kern = x + 1e-7                                            # (C, N)
    # rsqrt lands on the EUP slot (no VALU divide).  No eps in the denominator,
    # matching the PyTorch reference exactly.
    inv_norm = jax.lax.rsqrt(jnp.sum(kern * kern, axis=0, keepdims=True))
    kern_norm = kern * inv_norm                                # (C, N)

    # S[k, q] = sum_c kern_norm[c, k] * xpad[c, q]   (MXU, contract over C)
    s = jax.lax.dot_general(kern_norm, xp, (((0,), (0,)), ((), ())),
                            preferred_element_type=jnp.float32)  # (N, TP)
    s = s + g

    # Softmax over the kernel axis (axis 0); normalization deferred past the
    # second matmul, then applied as a column scale on the small (C, TP)
    # result instead of the (N, TP) probabilities.
    s = s - jnp.max(s, axis=0, keepdims=True)
    e = jnp.exp(s)                                             # (N, TP)
    o = jnp.dot(kern, e, preferred_element_type=jnp.float32)   # (C, TP)
    den = jnp.sum(e, axis=0, keepdims=True)                    # (1, TP)
    # EUP approximate reciprocal + one Newton step (2 extra VALU ops on a
    # single row): ~f32-exact at negligible cost.
    r = pl.reciprocal(den, approx=True)
    inv_den = r * (2.0 - den * r)
    o_ref[...] = (o * inv_den).astype(o_ref.dtype)


def _pick_tp(n, p):
    """Choose the padded-position tile size TP.

    Single tile for small maps (per-step overhead ~0.35us would dominate);
    otherwise keep TP a multiple of 128 (lane-dense loads/stores) and size the
    f32 (N, TP) gate block so that double buffering (2x) plus the in-kernel
    (N, TP) exp temporary (~2x more) stay comfortably under the default
    scoped-VMEM limit on all chips (v5e 16 MiB, v6e/v7x 32 MiB).
    """
    if p <= 512:
        return p
    budget_bytes = 2 * 1024 * 1024          # per gate buffer (x4 total live)
    tp = (budget_bytes // (n * 4)) // 128 * 128
    return int(max(128, min(p, tp)))


def att_forward(inputs, gate_scores, patch_size=3):
    """Pallas equivalent of Att.forward.

    inputs:      (bz, C, H, W)               NCHW features.
    gate_scores: (bz, H*W, H+2p, W+2p)       p = patch_size // 2.
    returns:     (bz, C, H, W)
    """
    bz, C, H, W = inputs.shape
    N = H * W
    pad = patch_size // 2
    Hp, Wp = H + 2 * pad, W + 2 * pad
    P = Hp * Wp

    # Free reshapes (merge contiguous minor dims) -- no HBM copy of the gate.
    x = inputs.reshape(bz, C, N)
    g = gate_scores.reshape(bz, N, P)
    # Tiny padded-feature tensor (bz*C*P elements), matches conv2d zero pad.
    x_pad = jnp.pad(inputs, ((0, 0), (0, 0), (pad, pad), (pad, pad)))
    x_pad = x_pad.reshape(bz, C, P)

    TP = _pick_tp(N, P)
    n_pt = pl.cdiv(P, TP)

    out = pl.pallas_call(
        att_kernel,
        out_shape=jax.ShapeDtypeStruct((bz, C, P), inputs.dtype),
        grid=(bz, n_pt),
        in_specs=[
            pl.BlockSpec((None, C, N), lambda b, pt: (b, 0, 0)),
            pl.BlockSpec((None, C, TP), lambda b, pt: (b, 0, pt)),
            pl.BlockSpec((None, N, TP), lambda b, pt: (b, 0, pt)),
        ],
        out_specs=pl.BlockSpec((None, C, TP), lambda b, pt: (b, 0, pt)),
        compiler_params=pltpu.CompilerParams(
            dimension_semantics=("parallel", "parallel")),
        cost_estimate=pl.CostEstimate(
            flops=4 * bz * C * N * P,
            transcendentals=bz * N * P,
            bytes_accessed=4 * bz * (N * P + 2 * C * P + C * N)),
    )(x, x_pad, g)

    # conv_transpose2d(padding=pad) crop: keep the interior (tiny copy).
    out = out.reshape(bz, C, Hp, Wp)[:, :, pad:pad + H, pad:pad + W]
    return out


def att_reference(inputs, gate_scores, patch_size=3):
    """Pure-JAX reference mirroring the PyTorch forward exactly."""
    bz, C, H, W = inputs.shape
    N = H * W
    pad = patch_size // 2
    outs = []
    for i in range(bz):
        fmap = inputs[i]                                    # (C, H, W)
        kern = inputs[i].reshape(C, N).T + 1e-7             # (N, C)
        norm = jnp.sqrt(jnp.sum(kern ** 2, axis=1, keepdims=True))
        kn = kern / norm
        fpad = jnp.pad(fmap, ((0, 0), (pad, pad), (pad, pad)))
        scores = jnp.einsum('kc,cyx->kyx', kn, fpad) + gate_scores[i]
        attn = jax.nn.softmax(scores, axis=0)
        full = jnp.einsum('kc,kyx->cyx', kern, attn)
        outs.append(full[:, pad:pad + H, pad:pad + W])
    return jnp.stack(outs, axis=0)


if __name__ == "__main__":
    patch_size = 3
    bz, C, H, W = 2, 4, 16, 16
    N = H * W
    pad = patch_size // 2

    key = jax.random.PRNGKey(0)
    k1, k2 = jax.random.split(key)
    inputs = jax.random.normal(k1, (bz, C, H, W), dtype=jnp.float32)
    gate_scores = jax.random.normal(
        k2, (bz, N, H + 2 * pad, W + 2 * pad), dtype=jnp.float32)

    out = att_forward(inputs, gate_scores, patch_size=patch_size)
    out = jax.block_until_ready(out)

    ref = jax.block_until_ready(att_reference(inputs, gate_scores, patch_size))
    np.testing.assert_allclose(np.asarray(out), np.asarray(ref),
                               rtol=2e-3, atol=2e-3)
    print("KERNEL_OK")
</pallas_src>

<mosaic_0001>
module attributes {stable_mosaic.version = 11 : i64} {
  func.func @att_kernel(%arg0: i32, %arg1: i32, %arg2: memref<1x4x256xf32, #tpu.memory_space<vmem>>, %arg3: memref<1x4x324xf32, #tpu.memory_space<vmem>>, %arg4: memref<1x256x324xf32, #tpu.memory_space<vmem>>, %arg5: memref<1x4x324xf32, #tpu.memory_space<vmem>>) attributes {dimension_semantics = [#tpu.dimension_semantics<parallel>, #tpu.dimension_semantics<parallel>], iteration_bounds = array<i64: 2, 1>, scalar_prefetch = 0 : i64, scratch_operands = 0 : i64, tpu.core_type = #tpu.core_type<tc>, window_params = [{transform_indices = @transform_0, window_bounds = array<i64: 1, 4, 256>}, {transform_indices = @transform_1, window_bounds = array<i64: 1, 4, 324>}, {transform_indices = @transform_2, window_bounds = array<i64: 1, 256, 324>}, {transform_indices = @transform_3, window_bounds = array<i64: 1, 4, 324>}]} {
    %c0 = arith.constant 0 : index
    %c0_0 = arith.constant 0 : index
    %c0_1 = arith.constant 0 : index
    %0 = vector.load %arg2[%c0, %c0_0, %c0_1] : memref<1x4x256xf32, #tpu.memory_space<vmem>>, vector<1x4x256xf32>
    %1 = vector.shape_cast %0 : vector<1x4x256xf32> to vector<4x256xf32>
    %c0_2 = arith.constant 0 : index
    %c0_3 = arith.constant 0 : index
    %c0_4 = arith.constant 0 : index
    %2 = vector.load %arg3[%c0_2, %c0_3, %c0_4] : memref<1x4x324xf32, #tpu.memory_space<vmem>>, vector<1x4x324xf32>
    %3 = vector.shape_cast %2 : vector<1x4x324xf32> to vector<4x324xf32>
    %c0_5 = arith.constant 0 : index
    %c0_6 = arith.constant 0 : index
    %c0_7 = arith.constant 0 : index
    %4 = vector.load %arg4[%c0_5, %c0_6, %c0_7] : memref<1x256x324xf32, #tpu.memory_space<vmem>>, vector<1x256x324xf32>
    %5 = vector.shape_cast %4 : vector<1x256x324xf32> to vector<256x324xf32>
    %cst = arith.constant 1.000000e-07 : f32
    %6 = vector.broadcast %cst : f32 to vector<4x256xf32>
    %7 = arith.addf %1, %6 : vector<4x256xf32>
    %8 = arith.mulf %7, %7 : vector<4x256xf32>
    %cst_8 = arith.constant dense<0.000000e+00> : vector<256xf32>
    %9 = vector.multi_reduction <add>, %8, %cst_8 [0] : vector<4x256xf32> to vector<256xf32>
    %10 = vector.shape_cast %9 : vector<256xf32> to vector<1x256xf32>
    %11 = math.rsqrt %10 : vector<1x256xf32>
    %12 = vector.broadcast %11 : vector<1x256xf32> to vector<4x256xf32>
    %13 = arith.mulf %7, %12 : vector<4x256xf32>
    %cst_9 = arith.constant dense<0.000000e+00> : vector<256x324xf32>
    %14 = tpu.matmul %13, %3, %cst_9 {dimension_numbers = #tpu.dot_dimension_numbers<[0], [0], [1], [1], [0, 1, 1, 1], [], []>} : vector<4x256xf32>, vector<4x324xf32>, vector<256x324xf32> -> vector<256x324xf32>
    %15 = arith.addf %14, %5 : vector<256x324xf32>
    %cst_10 = arith.constant dense<0xFF800000> : vector<324xf32>
    %16 = vector.multi_reduction <maximumf>, %15, %cst_10 [0] : vector<256x324xf32> to vector<324xf32>
    %17 = vector.shape_cast %16 : vector<324xf32> to vector<1x324xf32>
    %18 = vector.broadcast %17 : vector<1x324xf32> to vector<256x324xf32>
    %19 = arith.subf %15, %18 : vector<256x324xf32>
    %20 = math.exp %19 : vector<256x324xf32>
    %cst_11 = arith.constant dense<0.000000e+00> : vector<4x324xf32>
    %21 = tpu.matmul %7, %20, %cst_11 {dimension_numbers = #tpu.dot_dimension_numbers<[1], [0], [0], [1], [0, 0, 1, 1], [], []>} : vector<4x256xf32>, vector<256x324xf32>, vector<4x324xf32> -> vector<4x324xf32>
    %cst_12 = arith.constant dense<0.000000e+00> : vector<324xf32>
    %22 = vector.multi_reduction <add>, %20, %cst_12 [0] : vector<256x324xf32> to vector<324xf32>
    %23 = vector.shape_cast %22 : vector<324xf32> to vector<1x324xf32>
    %24 = tpu.reciprocal %23 {approx = true} : vector<1x324xf32> -> vector<1x324xf32>
    %25 = arith.mulf %23, %24 : vector<1x324xf32>
    %cst_13 = arith.constant 2.000000e+00 : f32
    %26 = vector.broadcast %cst_13 : f32 to vector<1x324xf32>
    %27 = arith.subf %26, %25 : vector<1x324xf32>
    %28 = arith.mulf %24, %27 : vector<1x324xf32>
    %29 = vector.broadcast %28 : vector<1x324xf32> to vector<4x324xf32>
    %30 = arith.mulf %21, %29 : vector<4x324xf32>
    %c0_14 = arith.constant 0 : index
    %c0_15 = arith.constant 0 : index
    %c0_16 = arith.constant 0 : index
    %31 = vector.load %arg5[%c0_14, %c0_15, %c0_16] : memref<1x4x324xf32, #tpu.memory_space<vmem>>, vector<1x4x324xf32>
    %32 = vector.shape_cast %31 : vector<1x4x324xf32> to vector<4x324xf32>
    %33 = vector.shape_cast %30 : vector<4x324xf32> to vector<1x4x324xf32>
    tpu.vector_store %arg5[%c0_14, %c0_15, %c0_16], %33 {strides = array<i32>} : memref<1x4x324xf32, #tpu.memory_space<vmem>>, vector<1x4x324xf32>,
    return
  }
  func.func @transform_0(%arg0: i32, %arg1: i32) -> (i32, i32, i32) {
    %c0_i32 = arith.constant 0 : i32
    %c0_i32_0 = arith.constant 0 : i32
    %c0_i32_1 = arith.constant 0 : i32
    return %arg0, %c0_i32, %c0_i32_0 : i32, i32, i32
  }
  func.func @transform_1(%arg0: i32, %arg1: i32) -> (i32, i32, i32) {
    %c0_i32 = arith.constant 0 : i32
    %c0_i32_0 = arith.constant 0 : i32
    return %arg0, %c0_i32, %arg1 : i32, i32, i32
  }
  func.func @transform_2(%arg0: i32, %arg1: i32) -> (i32, i32, i32) {
    %c0_i32 = arith.constant 0 : i32
    %c0_i32_0 = arith.constant 0 : i32
    return %arg0, %c0_i32, %arg1 : i32, i32, i32
  }
  func.func @transform_3(%arg0: i32, %arg1: i32) -> (i32, i32, i32) {
    %c0_i32 = arith.constant 0 : i32
    %c0_i32_0 = arith.constant 0 : i32
    return %arg0, %c0_i32, %arg1 : i32, i32, i32
  }
}

</mosaic_0001>

<bundles_post_ra>
// kernel: tpu_custom_call.1
= control target key start
LH: loop header
LB: loop body
LE: loop exit
PB: predicated region body
PF: predicated region fallthrough
CT: control target
= control target key end

     0   :  { %8 = vsyncpa [#allocation3], 0  ;;  %s4360_s0 = inlined_call_operand.vmem [shape: f32[2,4,256], index: 0, kind: input, shape index: {}]   ;;  %s4361_s1 = inlined_call_operand.vmem [shape: f32[2,4,324], index: 1, kind: input, shape index: {}]   ;;  %s4362_s2 = inlined_call_operand.vmem [shape: f32[2,256,324], index: 2, kind: input, shape index: {}]   ;;  %s4363_s3 = inlined_call_operand.hbm [shape: f32[2,4,324], index: 3, kind: output, shape index: {}]  }
   0x1   :  { %10 = vsyncpa [#allocation3 + $0x1], 0  ;;  %s2562_s12 = smov 0   ;;  %s2564_s13 = smov 0  }
   0x2   :  { %s2566_s14 = smov 0   ;;  %s2568_s15 = smov 0  }
   0x3   :  { %s2570_s16 = smov 0   ;;  %s2572_s17 = smov 0  }
   0x4 LB: > { %s1901_s18 = sadd.s32 4294967295, %s2538_s17   ;;  %s1902_s19 = sadd.s32 4294967294, %s2538_s17   ;;  %s2538_s17 = sphi %s2572_s17, %s16_s17   ;;  %s2534_s16 = sphi %s2570_s16, %s4739_s16   ;;  %s2530_s15 = sphi %s2568_s15, %s4738_s15   ;;  %s2526_s14 = sphi %s2566_s14, %s4737_s14   ;;  %s2522_s13 = sphi %s2564_s13, %s4736_s13   ;;  %s2518_s12 = sphi %s2562_s12, %s4735_s12  }
   0x5   : > { %s28_s20 = sadd.s32 1, %s2534_s16  ;;  %s119_s21 = sadd.s32 1, %s2526_s14 }
   0x6   : > { %p30_p0 = scmp.ge.s32.totalorder %s28_s20, 2  ;;  %p129_p1 = scmp.ne.s32.totalorder %s2526_s14, %s2522_s13 }
   0x7   : > { %p130_p2 = scmp.eq.s32.totalorder %s1901_s18, 1  ;;  %p135_p3 = scmp.ne.s32.totalorder %s2522_s13, %s2518_s12 }
   0x8   : > { %s4741_s20 = smov (%p30_p0, %s28_s20), 0  ;;  %p136_p5 = scmp.eq.s32.totalorder %s1902_s19, 1 }
   0x9   : > { %p2602_p4 = por %p130_p2, %p129_p1  ;;  %s114_s23 = ssub.s32 %s2534_s16, %s4741_s20 }
   0xa   : > { %p1905_p6 = scmp.ge.s32.totalorder %s2538_s17, 1  ;;  %p117_p7 = scmp.eq.s32.totalorder %s114_s23, 0 }
   0xb   : > { %p2609_p8 = por %p136_p5, %p135_p3  ;;  %p188_p9 = scmp.lt.s32.totalorder %s2538_s17, 3 }
   0xc   : > { %s2615_s25 = scalar_select %p117_p7, %s2526_s14, %s119_s21  }
   0xd   : > { %p189_p10 = pnand %p1905_p6, %p188_p9 }
   0xf   : > { %192 = sbr.rel (%p189_p10) target bundleno = 943 (0x3af), region = 32 }
  0x16   : > { %p230_p11 = scmp.lt.s32.totalorder %s2530_s15, 1  ;;  %v2540_v0 = vmov 0.0   ;;  %vm360_vm0 = vcmask 1043456   ;;  %vm452_vm1 = vcmask 31744   ;;  %vm1111_vm2 = vcmask 556032   ;;  %s227_s18 = sand.u32 1, %s2522_s13  }
  0x17   : > { %619 = vmatprep.mubr.f32.mxu0 %v2540_v0  ;;  %793 = vmatprep.mubr.f32.mxu1 %v2540_v0  ;;  %s2197_s19 = smul.u32 12, %s227_s18  ;;  %vm1776_vm3 = vcmask 551936  }
  0x18   : > { %s2621_s26 = scalar_select %p230_p11, %s2530_s15, 1 }
  0x19   : > { %s229_s21 = scalar_lea.vmem [#allocation2], %s2197_s19  ;;  %s2200_s23 = smul.u32 192, %s2530_s15 }
  0x1a   : > { %s1980_s27 = sshll.u32 %s2621_s26, 3  ;;  %s2198_s4 = smul.u32 12, %s2621_s26 }
  0x1b   : > { %s234_s30 = scalar_lea.vmem %s4360_s0, %s1980_s27  ;;  %s2199_s8 = smul.u32 768, %s2621_s26 }
  0x1c   : > { %v256_v1 = vld [vmem:[%s234_s30] sm:$0xff]  ;;  %s2633_s7 = scalar_lea.vmem %s4361_s1, %s2198_s4  ;;  %s1795_s26 = sshll.u32 %s229_s21, 4  ;;  %s4313_s26 = int_to_ptr.vmem [resolvable:$true] %s1795_s26 }
  0x1d   : > { %v2628_v2 = vadd.f32 1e-07, %v256_v1  ;;  %v257_v3 = vld [vmem:[%s2633_s7] sm:$0xff]  ;;  %v2646_v26 = vld [vmem:[%s2633_s7 + $0x8] sm:$0xf]  ;;  %s2818_s11 = scalar_lea.vmem %s4362_s2, %s2199_s8  ;;  %s4311_s29 = scalar_lea.hbm %s4363_s3, %s2200_s23 }
  0x1e   : > { %v451_v5 = vcombine.high %v257_v3, %v257_v3  ;;  %v259_v63 = vld [vmem:[%s2818_s11] sm:$0xff]  ;;  %v260_v1 = vld [vmem:[%s2818_s11 + $0x8] sm:$0xff]  ;;  %s1779_s30 = scalar_lea.sflag [#allocation3], %s227_s18  ;;  %s2460_s15 = scalar_lea.vmem %s4313_s26, 192 }
  0x1f   : > { %4457 = vst [vmem:[#allocation5_spill] sm:$0xff] %v2628_v2  ;;  %v356_v4 = vmul.f32 %v2628_v2, %v2628_v2  ;;  %p2461_p12 = scmp.ne.s32.totalorder %s4313_s26, %s2460_s15  ;;  %s2541_s4 = smov [#allocation2]  }
  0x20   : > { %1910 = vmatprep.subr.msk.mxu0 %vm360_vm0, %v451_v5  ;;  %2195 = vmatprep.subr.msk.mxu1 %vm360_vm0, %v451_v5  ;;  %s2464_s5 = sshll.u32 %s2541_s4, 4  ;;  %s2465_s5 = int_to_ptr.vmem [resolvable:$false] %s2464_s5 }
  0x21   : > { %v358_v6 = vcombine.high %v356_v4, %v356_v4  ;;  %v361_v7 = vsel %vm360_vm0, %v356_v4, 0.0  ;;  %1911 = vmatpush1.msk.msra.mxu0 %vm360_vm0, %v257_v3  ;;  %2196 = vmatpush1.msk.msra.mxu1 %vm360_vm0, %v257_v3  ;;  %v266_v3 = vld [vmem:[%s2818_s11 + $0x38] sm:$0xff]  ;;  %p2462_p13 = pnand %p2461_p12, %p2602_p4  ;;  %s2466_s6 = scalar_lea.vmem %s2465_s5, 384 }
  0x22   : > { %v362_v8 = vrot.slane %v361_v7, 4  ;;  %2049 = vmatprep.subr.msk.mxu1 %vm360_vm0, %v2646_v26  ;;  %p2467_p1 = scmp.lt.s32.totalorder %s4313_s26, %s2465_s5  ;;  %p2468_p2 = scmp.lt.s32.totalorder %s2466_s6, %s2460_s15 }
  0x23   : > { %v368_v9 = vsel %vm360_vm0, %v358_v6, 0.0  ;;  %p2463_p0 = pneg %p2462_p13 }
  0x24   : > { %v363_v10 = vadd.f32 %v362_v8, %v361_v7  ;;  %v369_v11 = vrot.slane %v368_v9, 4  ;;  %p2469_p3 = por %p2468_p2, %p2467_p1 }
  0x26   : > { %v364_v12 = vrot.slane %v363_v10, 2  ;;  %v370_v13 = vadd.f32 %v369_v11, %v368_v9  ;;  %v262_v9 = vld [vmem:[%s2818_s11 + $0x18] sm:$0xff]  ;;  %v268_v11 = vld [vmem:[%s2818_s11 + $0x48] sm:$0xff]  ;;  %p2470_p5 = pnand %p2469_p3, %p2463_p0 }
  0x28   : > { %v365_v14 = vadd.f32 %v364_v12, %v363_v10  ;;  %v371_v15 = vrot.slane %v370_v13, 2  ;;  %v263_v12 = vld [vmem:[%s2818_s11 + $0x20] sm:$0xff] }
  0x2a   : > { %v366_v16 = vrot.slane %v365_v14, 1  ;;  %v372_v17 = vadd.f32 %v371_v15, %v370_v13 }
  0x2c   : > { %v367_v18 = vadd.f32 %v366_v16, %v365_v14  ;;  %v373_v19 = vrot.slane %v372_v17, 1  ;;  %v269_v14 = vld [vmem:[%s2818_s11 + $0x50] sm:$0xff] }
  0x2e   : > { %v374_v20 = vadd.f32 %v373_v19, %v372_v17  ;;  %2258 = vrsqrt.f32 %v367_v18 }
  0x30   : > { %2260 = vrsqrt.f32 %v374_v20 }
  0x38   : > { %v2259_v21 = vpop.eup %2258 }
  0x3a   : > { %v2261_v22 = vpop.eup %2260 }
  0x3b   : > { %v379_v23 = vcombine.low %v2259_v21, %v2261_v22  ;;  %v271_v22 = vld [vmem:[%s2818_s11 + $0x60] sm:$0xff] }
  0x3d   : > { %v381_v24 = vmul.f32 %v379_v23, %v2628_v2 }
  0x3f   : > { %385 = vxpose.xlu0.b32.start.end [1/1] (short) %v381_v24, 128  ;;  %v383_v25 = vcombine.high %v381_v24, %v381_v24  ;;  %v272_v24 = vld [vmem:[%s2818_s11 + $0x68] sm:$0xff] }
  0x7c   : > { %417 = vxpose.xlu0.b32.start.end [1/1] (short) %v383_v25, 128 }
  0xbf   : > { %v2650_v27 = vpop.trf.xlu0 }
  0xc0   : > { %1912 = vmatmul.mubr.msk.f32.vlgmr.msra.gmra.mrb[0].mxu0 %vm452_vm1, %v2650_v27 }
  0xc1   : > { %625 = vmatprep.mubr.f32.mxu0 %v2540_v0 }
  0xc3   : > { %v2655_v28 = vpop.trf.xlu0 }
  0xc4   : > { %1913 = vmatmul.mubr.msk.f32.gmra.mrb[2].mxu0 %vm452_vm1, %v2655_v28 }
  0xc5   : > { %631 = vmatprep.mubr.f32.mxu0 %v2540_v0 }
  0xc7   : > { %v2660_v29 = vpop.trf.xlu0 }
  0xc8   : > { %1914 = vmatmul.mubr.msk.f32.gmra.mrb[4].mxu0 %vm452_vm1, %v2660_v29 }
  0xc9   : > { %637 = vmatprep.mubr.f32.mxu0 %v2540_v0 }
  0xcb   : > { %v2665_v30 = vpop.trf.xlu0 }
  0xcc   : > { %1915 = vmatmul.mubr.msk.f32.gmra.mrb[6].mxu0 %vm452_vm1, %v2665_v30 }
  0xcd   : > { %643 = vmatprep.mubr.f32.mxu0 %v2540_v0 }
  0xcf   : > { %v2670_v31 = vpop.trf.xlu0 }
  0xd0   : > { %1916 = vmatmul.mubr.msk.f32.gmra.mrb[8].mxu0 %vm452_vm1, %v2670_v31 }
  0xd1   : > { %649 = vmatprep.mubr.f32.mxu0 %v2540_v0 }
  0xd3   : > { %v2675_v32 = vpop.trf.xlu0 }
  0xd4   : > { %1917 = vmatmul.mubr.msk.f32.gmra.mrb[10].mxu0 %vm452_vm1, %v2675_v32 }
  0xd5   : > { %655 = vmatprep.mubr.f32.mxu0 %v2540_v0 }
  0xd7   : > { %v2680_v33 = vpop.trf.xlu0 }
  0xd8   : > { %1918 = vmatmul.mubr.msk.f32.gmra.mrb[12].mxu0 %vm452_vm1, %v2680_v33 }
  0xd9   : > { %661 = vmatprep.mubr.f32.mxu0 %v2540_v0 }
  0xdb   : > { %v2685_v34 = vpop.trf.xlu0 }
  0xdc   : > { %1919 = vmatmul.mubr.msk.f32.gmra.mrb[14].mxu0 %vm452_vm1, %v2685_v34 }
  0xdd   : > { %667 = vmatprep.mubr.f32.mxu0 %v2540_v0 }
  0xdf   : > { %v2690_v35 = vpop.trf.xlu0 }
  0xe0   : > { %1920 = vmatmul.mubr.msk.f32.gmra.mrb[16].mxu0 %vm452_vm1, %v2690_v35 }
  0xe1   : > { %673 = vmatprep.mubr.f32.mxu0 %v2540_v0 }
  0xe3   : > { %v2695_v36 = vpop.trf.xlu0 }
  0xe4   : > { %1921 = vmatmul.mubr.msk.f32.gmra.mrb[18].mxu0 %vm452_vm1, %v2695_v36 }
  0xe5   : > { %679 = vmatprep.mubr.f32.mxu0 %v2540_v0 }
  0xe7   : > { %v2700_v37 = vpop.trf.xlu0 }
  0xe8   : > { %1922 = vmatmul.mubr.msk.f32.gmra.mrb[20].mxu0 %vm452_vm1, %v2700_v37 }
  0xe9   : > { %685 = vmatprep.mubr.f32.mxu0 %v2540_v0 }
  0xeb   : > { %v2705_v38 = vpop.trf.xlu0 }
  0xec   : > { %1923 = vmatmul.mubr.msk.f32.gmra.mrb[22].mxu0 %vm452_vm1, %v2705_v38 }
  0xed   : > { %691 = vmatprep.mubr.f32.mxu0 %v2540_v0 }
  0xef   : > { %v2710_v39 = vpop.trf.xlu0 }
  0xf0   : > { %1924 = vmatmul.mubr.msk.f32.gmra.mrb[24].mxu0 %vm452_vm1, %v2710_v39 }
  0xf1   : > { %697 = vmatprep.mubr.f32.mxu0 %v2540_v0 }
  0xf3   : > { %v2715_v40 = vpop.trf.xlu0 }
  0xf4   : > { %1925 = vmatmul.mubr.msk.f32.gmra.mrb[26].mxu0 %vm452_vm1, %v2715_v40 }
  0xf5   : > { %703 = vmatprep.mubr.f32.mxu0 %v2540_v0 }
  0xf7   : > { %v2720_v41 = vpop.trf.xlu0 }
  0xf8   : > { %1926 = vmatmul.mubr.msk.f32.gmra.mrb[28].mxu0 %vm452_vm1, %v2720_v41 }
  0xf9   : > { %709 = vmatprep.mubr.f32.mxu0 %v2540_v0 }
  0xfb   : > { %v2725_v42 = vpop.trf.xlu0 }
  0xfc   : > { %1927 = vmatmul.mubr.msk.f32.gmra.mrb[30].mxu0 %vm452_vm1, %v2725_v42 }
  0xfd   : > { %715 = vmatprep.mubr.f32.mxu0 %v2540_v0 }
  0xff   : > { %v2730_v43 = vpop.trf.xlu0 }
 0x100   : > { %1928 = vmatmul.mubr.msk.f32.gmra.mrb[32].mxu0 %vm452_vm1, %v2730_v43 }
 0x101   : > { %721 = vmatprep.mubr.f32.mxu0 %v2540_v0 }
 0x103   : > { %v434_v44 = vpop.trf.xlu0 }
 0x104   : > { %1929 = vmatmul.mubr.msk.f32.gmra.mrb[34].mxu0 %vm452_vm1, %v434_v44 }
 0x105   : > { %727 = vmatprep.mubr.f32.mxu0 %v2540_v0 }
 0x107   : > { %v435_v45 = vpop.trf.xlu0 }
 0x108   : > { %1930 = vmatmul.mubr.msk.f32.gmra.mrb[36].mxu0 %vm452_vm1, %v435_v45 }
 0x109   : > { %733 = vmatprep.mubr.f32.mxu0 %v2540_v0 }
 0x10b   : > { %v436_v46 = vpop.trf.xlu0 }
 0x10c   : > { %1931 = vmatmul.mubr.msk.f32.gmra.mrb[38].mxu0 %vm452_vm1, %v436_v46 }
 0x10d   : > { %739 = vmatprep.mubr.f32.mxu0 %v2540_v0 }
 0x10f   : > { %v437_v47 = vpop.trf.xlu0 }
 0x110   : > { %1932 = vmatmul.mubr.msk.f32.gmra.mrb[40].mxu0 %vm452_vm1, %v437_v47 }
 0x111   : > { %745 = vmatprep.mubr.f32.mxu0 %v2540_v0 }
 0x113   : > { %v438_v48 = vpop.trf.xlu0 }
 0x114   : > { %1933 = vmatmul.mubr.msk.f32.gmra.mrb[42].mxu0 %vm452_vm1, %v438_v48 }
 0x115   : > { %751 = vmatprep.mubr.f32.mxu0 %v2540_v0 }
 0x117   : > { %v439_v49 = vpop.trf.xlu0 }
 0x118   : > { %1934 = vmatmul.mubr.msk.f32.gmra.mrb[44].mxu0 %vm452_vm1, %v439_v49 }
 0x119   : > { %757 = vmatprep.mubr.f32.mxu0 %v2540_v0 }
 0x11b   : > { %v440_v50 = vpop.trf.xlu0 }
 0x11c   : > { %1935 = vmatmul.mubr.msk.f32.gmra.mrb[46].mxu0 %vm452_vm1, %v440_v50 }
 0x11d   : > { %763 = vmatprep.mubr.f32.mxu0 %v2540_v0 }
 0x11f   : > { %v441_v51 = vpop.trf.xlu0 }
 0x120   : > { %1936 = vmatmul.mubr.msk.f32.gmra.mrb[48].mxu0 %vm452_vm1, %v441_v51 }
 0x121   : > { %769 = vmatprep.mubr.f32.mxu0 %v2540_v0 }
 0x123   : > { %v442_v52 = vpop.trf.xlu0 }
 0x124   : > { %1937 = vmatmul.mubr.msk.f32.gmra.mrb[50].mxu0 %vm452_vm1, %v442_v52 }
 0x125   : > { %775 = vmatprep.mubr.f32.mxu0 %v2540_v0 }
 0x127   : > { %v443_v53 = vpop.trf.xlu0 }
 0x128   : > { %1938 = vmatmul.mubr.msk.f32.gmra.mrb[52].mxu0 %vm452_vm1, %v443_v53 }
 0x129   : > { %781 = vmatprep.mubr.f32.mxu0 %v2540_v0 }
 0x12b   : > { %v444_v54 = vpop.trf.xlu0 }
 0x12c   : > { %1939 = vmatmul.mubr.msk.f32.gmra.mrb[54].mxu0 %vm452_vm1, %v444_v54 }
 0x12d   : > { %787 = vmatprep.mubr.f32.mxu0 %v2540_v0 }
 0x12f   : > { %v445_v55 = vpop.trf.xlu0 }
 0x130   : > { %1940 = vmatmul.mubr.msk.f32.gmra.mrb[56].mxu0 %vm452_vm1, %v445_v55 }
 0x133   : > { %v446_v56 = vpop.trf.xlu0 }
 0x134   : > { %1941 = vmatmul.mubr.msk.f32.vlgmr.msra.gmra.mrb[0].mxu1 %vm452_vm1, %v446_v56 }
 0x135   : > { %2050 = vmatpush3.msk.msra.mxu1 %vm360_vm0, %v2646_v26  ;;  %799 = vmatprep.mubr.f32.mxu1 %v2540_v0 }
 0x137   : > { %v447_v57 = vpop.trf.xlu0 }
 0x138   : > { %1942 = vmatmul.mubr.msk.f32.gmra.mrb[2].mxu1 %vm452_vm1, %v447_v57 }
 0x139   : > { %805 = vmatprep.mubr.f32.mxu1 %v2540_v0  ;;  %v265_v0 = vld [vmem:[%s2818_s11 + $0x30] sm:$0xff] }
 0x13b   : > { %v448_v58 = vpop.trf.xlu0 }
 0x13c   : > { %1943 = vmatmul.mubr.msk.f32.gmra.mrb[4].mxu1 %vm452_vm1, %v448_v58 }
 0x13d   : > { %2051 = vmatprep.mubr.msk.f32.mxu1 %vm452_vm1, %v2650_v27 }
 0x140   : > { %2052 = vmatmul.mubr.msk.f32.vlgmr.msra.gmra.mrb[6].mxu1 %vm452_vm1, %v2655_v28 }
 0x141   : > { %2054 = vmatprep.mubr.msk.f32.mxu1 %vm452_vm1, %v2660_v29 }
 0x144   : > { %2055 = vmatmul.mubr.msk.f32.gmra.mrb[8].mxu1 %vm452_vm1, %v2665_v30  ;;  %v274_v30 = vld [vmem:[%s2818_s11 + $0x78] sm:$0xff] }
 0x145   : > { %2057 = vmatprep.mubr.msk.f32.mxu1 %vm452_vm1, %v2670_v31 }
 0x148   : > { %2058 = vmatmul.mubr.msk.f32.gmra.mrb[10].mxu1 %vm452_vm1, %v2675_v32  ;;  %v275_v32 = vld [vmem:[%s2818_s11 + $0x80] sm:$0xff] }
 0x149   : > { %2060 = vmatprep.mubr.msk.f32.mxu1 %vm452_vm1, %v2680_v33 }
 0x14c   : > { %2061 = vmatmul.mubr.msk.f32.gmra.mrb[12].mxu1 %vm452_vm1, %v2685_v34 }
 0x14d   : > { %2063 = vmatprep.mubr.msk.f32.mxu1 %vm452_vm1, %v2690_v35 }
 0x150   : > { %2064 = vmatmul.mubr.msk.f32.gmra.mrb[14].mxu1 %vm452_vm1, %v2695_v36 }
 0x151   : > { %2066 = vmatprep.mubr.msk.f32.mxu1 %vm452_vm1, %v2700_v37 }
 0x154   : > { %2067 = vmatmul.mubr.msk.f32.gmra.mrb[16].mxu1 %vm452_vm1, %v2705_v38  ;;  %v277_v38 = vld [vmem:[%s2818_s11 + $0x90] sm:$0xff] }
 0x155   : > { %2069 = vmatprep.mubr.msk.f32.mxu1 %vm452_vm1, %v2710_v39 }
 0x158   : > { %2070 = vmatmul.mubr.msk.f32.gmra.mrb[18].mxu1 %vm452_vm1, %v2715_v40  ;;  %v278_v40 = vld [vmem:[%s2818_s11 + $0x98] sm:$0xff] }
 0x159   : > { %2072 = vmatprep.mubr.msk.f32.mxu1 %vm452_vm1, %v2720_v41 }
 0x15c   : > { %2073 = vmatmul.mubr.msk.f32.gmra.mrb[20].mxu1 %vm452_vm1, %v2725_v42 }
 0x15d   : > { %2075 = vmatprep.mubr.msk.f32.mxu1 %vm452_vm1, %v2730_v43 }
 0x160   : > { %2076 = vmatmul.mubr.msk.f32.gmra.mrb[22].mxu1 %vm452_vm1, %v434_v44 }
 0x161   : > { %2078 = vmatprep.mubr.msk.f32.mxu1 %vm452_vm1, %v435_v45 }
 0x164   : > { %2079 = vmatmul.mubr.msk.f32.gmra.mrb[24].mxu1 %vm452_vm1, %v436_v46  ;;  %v280_v46 = vld [vmem:[%s2818_s11 + $0xa8] sm:$0xff] }
 0x165   : > { %2081 = vmatprep.mubr.msk.f32.mxu1 %vm452_vm1, %v437_v47 }
 0x168   : > { %2082 = vmatmul.mubr.msk.f32.gmra.mrb[26].mxu1 %vm452_vm1, %v438_v48  ;;  %v281_v48 = vld [vmem:[%s2818_s11 + $0xb0] sm:$0xff] }
 0x169   : > { %2084 = vmatprep.mubr.msk.f32.mxu1 %vm452_vm1, %v439_v49 }
 0x16c   : > { %2085 = vmatmul.mubr.msk.f32.gmra.mrb[28].mxu1 %vm452_vm1, %v440_v50 }
 0x16d   : > { %2087 = vmatprep.mubr.msk.f32.mxu1 %vm452_vm1, %v441_v51 }
 0x170   : > { %2088 = vmatmul.mubr.msk.f32.gmra.mrb[30].mxu1 %vm452_vm1, %v442_v52 }
 0x171   : > { %2090 = vmatprep.mubr.msk.f32.mxu1 %vm452_vm1, %v443_v53 }
 0x174   : > { %2091 = vmatmul.mubr.msk.f32.gmra.mrb[32].mxu1 %vm452_vm1, %v444_v54  ;;  %v283_v54 = vld [vmem:[%s2818_s11 + $0xc0] sm:$0xff] }
 0x175   : > { %2093 = vmatprep.mubr.msk.f32.mxu1 %vm452_vm1, %v445_v55 }
 0x178   : > { %2094 = vmatmul.mubr.msk.f32.gmra.mrb[34].mxu1 %vm452_vm1, %v446_v56  ;;  %v284_v56 = vld [vmem:[%s2818_s11 + $0xc8] sm:$0xff] }
 0x179   : > { %2096 = vmatprep.mubr.msk.f32.mxu1 %vm452_vm1, %v447_v57 }
 0x17c   : > { %2097 = vmatmul.mubr.msk.f32.gmra.mrb[36].mxu1 %vm452_vm1, %v448_v58 }
 0x193   : > { %v621_v59 = vpop.f32.mrb[0].mxu0 }
 0x194   : > { %v623_v60 = vpop.f32.mrb[1].mxu0  ;;  %v2824_v5 = vadd.f32 %v621_v59, %v259_v63 }
 0x195   : > { %v2828_v8 = vadd.f32 %v623_v60, %v260_v1 }
 0x197   : > { %v627_v61 = vpop.f32.mrb[2].mxu0 }
 0x198   : > { %v629_v62 = vpop.f32.mrb[3].mxu0  ;;  %v2840_v17 = vadd.f32 %v627_v61, %v262_v9 }
 0x199   : > { %v2844_v20 = vadd.f32 %v629_v62, %v263_v12  ;;  %v286_v62 = vld [vmem:[%s2818_s11 + $0xd8] sm:$0xff] }
 0x19b   : > { %v633_v4 = vpop.f32.mrb[4].mxu0 }
 0x19c   : > { %v2826_v6 = vadd.f32 %v633_v4, %v265_v0  ;;  %v635_v7 = vpop.f32.mrb[5].mxu0  ;;  %v287_v0 = vld [vmem:[%s2818_s11 + $0xe0] sm:$0xff] }
 0x19d   : > { %v2831_v10 = vadd.f32 %v635_v7, %v266_v3 }
 0x19e   : > { %v1037_v13 = vmax.f32 %v2824_v5, %v2826_v6 }
 0x19f   : > { %v1074_v15 = vmax.f32 %v2828_v8, %v2831_v10  ;;  %v639_v16 = vpop.f32.mrb[6].mxu0 }
 0x1a0   : > { %v2842_v18 = vadd.f32 %v639_v16, %v268_v11  ;;  %v641_v19 = vpop.f32.mrb[7].mxu0  ;;  %v289_v11 = vld [vmem:[%s2818_s11 + $0xf0] sm:$0xff] }
 0x1a1   : > { %v2846_v21 = vadd.f32 %v641_v19, %v269_v14 }
 0x1a2   : > { %v1038_v23 = vmax.f32 %v2840_v17, %v2842_v18 }
 0x1a3   : > { %v1075_v25 = vmax.f32 %v2844_v20, %v2846_v21  ;;  %v645_v26 = vpop.f32.mrb[8].mxu0 }
 0x1a4   : > { %v2854_v27 = vadd.f32 %v645_v26, %v271_v22  ;;  %v647_v28 = vpop.f32.mrb[9].mxu0 }
 0x1a5   : > { %v2856_v29 = vadd.f32 %v647_v28, %v272_v24 }
 0x1a6   : > { %v1039_v31 = vmax.f32 %v1037_v13, %v2854_v27  ;;  %v290_v13 = vld [vmem:[%s2818_s11 + $0xf8] sm:$0xff] }
 0x1a7   : > { %v1076_v33 = vmax.f32 %v1074_v15, %v2856_v29  ;;  %v651_v34 = vpop.f32.mrb[10].mxu0 }
 0x1a8   : > { %v2862_v35 = vadd.f32 %v651_v34, %v274_v30  ;;  %v653_v36 = vpop.f32.mrb[11].mxu0 }
 0x1a9   : > { %v2864_v37 = vadd.f32 %v653_v36, %v275_v32  ;;  %v296_v36 = vld [vmem:[%s2818_s11 + $0x128] sm:$0xff] }
 0x1aa   : > { %v1040_v39 = vmax.f32 %v1038_v23, %v2862_v35  ;;  %v292_v23 = vld [vmem:[%s2818_s11 + $0x108] sm:$0xff] }
 0x1ab   : > { %v1077_v41 = vmax.f32 %v1075_v25, %v2864_v37  ;;  %v657_v42 = vpop.f32.mrb[12].mxu0  ;;  %v293_v25 = vld [vmem:[%s2818_s11 + $0x110] sm:$0xff] }
 0x1ac   : > { %v2870_v43 = vadd.f32 %v657_v42, %v277_v38  ;;  %v659_v44 = vpop.f32.mrb[13].mxu0 }
 0x1ad   : > { %v2872_v45 = vadd.f32 %v659_v44, %v278_v40  ;;  %v298_v44 = vld [vmem:[%s2818_s11 + $0x138] sm:$0xff] }
 0x1ae   : > { %v1041_v47 = vmax.f32 %v1039_v31, %v2870_v43 }
 0x1af   : > { %v1078_v49 = vmax.f32 %v1076_v33, %v2872_v45  ;;  %v663_v50 = vpop.f32.mrb[14].mxu0  ;;  %v295_v33 = vld [vmem:[%s2818_s11 + $0x120] sm:$0xff] }
 0x1b0   : > { %v2878_v51 = vadd.f32 %v663_v50, %v280_v46  ;;  %v665_v52 = vpop.f32.mrb[15].mxu0 }
 0x1b1   : > { %v2880_v53 = vadd.f32 %v665_v52, %v281_v48 }
 0x1b2   : > { %v1042_v55 = vmax.f32 %v1040_v39, %v2878_v51 }
 0x1b3   : > { %4458 = vst [vmem:[#allocation6_spill] sm:$0xff] %v2880_v53  ;;  %v1079_v57 = vmax.f32 %v1077_v41, %v2880_v53  ;;  %v669_v58 = vpop.f32.mrb[16].mxu0  ;;  %v279_v53 = vld [vmem:[%s2818_s11 + $0xa0] sm:$0xff] }
 0x1b4   : > { %v2886_v59 = vadd.f32 %v669_v58, %v283_v54  ;;  %v671_v60 = vpop.f32.mrb[17].mxu0 }
 0x1b5   : > { %v2888_v61 = vadd.f32 %v671_v60, %v284_v56 }
 0x1b6   : > { %v1043_v63 = vmax.f32 %v1041_v47, %v2886_v59  ;;  %v299_v47 = vld [vmem:[%s2818_s11 + $0x140] sm:$0xff] }
 0x1b7   : > { %4459 = vst [vmem:[#allocation7_spill] sm:$0xff] %v2888_v61  ;;  %v1080_v1 = vmax.f32 %v1078_v49, %v2888_v61  ;;  %v675_v3 = vpop.f32.mrb[18].mxu0  ;;  %v282_v61 = vld [vmem:[%s2818_s11 + $0xb8] sm:$0xff] }
 0x1b8   : > { %v2894_v4 = vadd.f32 %v675_v3, %v286_v62  ;;  %v677_v7 = vpop.f32.mrb[19].mxu0 }
 0x1b9   : > { %v2896_v9 = vadd.f32 %v677_v7, %v287_v0  ;;  %v305_v7 = vld [vmem:[%s2818_s11 + $0x170] sm:$0xff] }
 0x1ba   : > { %v1044_v12 = vmax.f32 %v1042_v55, %v2894_v4  ;;  %v301_v55 = vld [vmem:[%s2818_s11 + $0x150] sm:$0xff] }
 0x1bb   : > { %4460 = vst [vmem:[#allocation8_spill] sm:$0xff] %v2896_v9  ;;  %v1081_v14 = vmax.f32 %v1079_v57, %v2896_v9  ;;  %v681_v15 = vpop.f32.mrb[20].mxu0  ;;  %v302_v57 = vld [vmem:[%s2818_s11 + $0x158] sm:$0xff] }
 0x1bc   : > { %v2902_v16 = vadd.f32 %v681_v15, %v289_v11  ;;  %v683_v19 = vpop.f32.mrb[21].mxu0 }
 0x1bd   : > { %v2904_v22 = vadd.f32 %v683_v19, %v290_v13  ;;  %v307_v19 = vld [vmem:[%s2818_s11 + $0x180] sm:$0xff] }
 0x1be   : > { %v1045_v24 = vmax.f32 %v1043_v63, %v2902_v16 }
 0x1bf   : > { %4461 = vst [vmem:[#allocation9_spill] sm:$0xff] %v2904_v22  ;;  %v1082_v26 = vmax.f32 %v1080_v1, %v2904_v22  ;;  %v687_v28 = vpop.f32.mrb[22].mxu0  ;;  %v304_v1 = vld [vmem:[%s2818_s11 + $0x168] sm:$0xff] }
 0x1c0   : > { %v2910_v30 = vadd.f32 %v687_v28, %v292_v23  ;;  %v689_v31 = vpop.f32.mrb[23].mxu0  ;;  %v276_v22 = vld [vmem:[%s2818_s11 + $0x88] sm:$0xff] }
 0x1c1   : > { %v2912_v32 = vadd.f32 %v689_v31, %v293_v25 }
 0x1c2   : > { %v1046_v34 = vmax.f32 %v1044_v12, %v2910_v30 }
 0x1c3   : > { %4462 = vst [vmem:[#allocation10_spill] sm:$0xff] %v2912_v32  ;;  %v1083_v38 = vmax.f32 %v1081_v14, %v2912_v32  ;;  %v693_v39 = vpop.f32.mrb[24].mxu0 }
 0x1c4   : > { %v2918_v40 = vadd.f32 %v693_v39, %v295_v33  ;;  %v695_v41 = vpop.f32.mrb[25].mxu0 }
 0x1c5   : > { %v2920_v42 = vadd.f32 %v695_v41, %v296_v36 }
 0x1c6   : > { %v1047_v46 = vmax.f32 %v1045_v24, %v2918_v40  ;;  %v308_v24 = vld [vmem:[%s2818_s11 + $0x188] sm:$0xff] }
 0x1c7   : > { %4463 = vst [vmem:[#allocation11_spill] sm:$0xff] %v2920_v42  ;;  %v1084_v48 = vmax.f32 %v1082_v26, %v2920_v42  ;;  %v699_v49 = vpop.f32.mrb[26].mxu0  ;;  %v270_v42 = vld [vmem:[%s2818_s11 + $0x58] sm:$0xff] }
 0x1c8   : > { %v2926_v50 = vadd.f32 %v699_v49, %v298_v44  ;;  %v701_v52 = vpop.f32.mrb[27].mxu0 }
 0x1c9   : > { %v2928_v54 = vadd.f32 %v701_v52, %v299_v47  ;;  %v314_v52 = vld [vmem:[%s2818_s11 + $0x1b8] sm:$0xff] }
 0x1ca   : > { %v1048_v56 = vmax.f32 %v1046_v34, %v2926_v50  ;;  %v310_v34 = vld [vmem:[%s2818_s11 + $0x198] sm:$0xff] }
 0x1cb   : > { %4464 = vst [vmem:[#allocation12_spill] sm:$0xff] %v2928_v54  ;;  %v1085_v58 = vmax.f32 %v1083_v38, %v2928_v54  ;;  %v705_v60 = vpop.f32.mrb[28].mxu0  ;;  %v311_v38 = vld [vmem:[%s2818_s11 + $0x1a0] sm:$0xff] }
 0x1cc   : > { %v2934_v62 = vadd.f32 %v705_v60, %v301_v55  ;;  %v707_v63 = vpop.f32.mrb[29].mxu0 }
 0x1cd   : > { %v2936_v0 = vadd.f32 %v707_v63, %v302_v57  ;;  %v316_v63 = vld [vmem:[%s2818_s11 + $0x1c8] sm:$0xff] }
 0x1ce   : > { %v1049_v3 = vmax.f32 %v1047_v46, %v2934_v62 }
 0x1cf   : > { %4465 = vst [vmem:[#allocation13_spill] sm:$0xff] %v2936_v0  ;;  %v1086_v11 = vmax.f32 %v1084_v48, %v2936_v0  ;;  %v711_v12 = vpop.f32.mrb[30].mxu0  ;;  %v313_v48 = vld [vmem:[%s2818_s11 + $0x1b0] sm:$0xff] }
 0x1d0   : > { %v2942_v13 = vadd.f32 %v711_v12, %v304_v1  ;;  %v713_v14 = vpop.f32.mrb[31].mxu0 }
 0x1d1   : > { %v2944_v15 = vadd.f32 %v713_v14, %v305_v7 }
 0x1d2   : > { %v1050_v23 = vmax.f32 %v1048_v56, %v2942_v13 }
 0x1d3   : > { %4466 = vst [vmem:[#allocation14_spill] sm:$0xff] %v2944_v15  ;;  %v1087_v25 = vmax.f32 %v1085_v58, %v2944_v15  ;;  %v717_v26 = vpop.f32.mrb[32].mxu0 }
 0x1d4   : > { %v2950_v28 = vadd.f32 %v717_v26, %v307_v19  ;;  %v719_v31 = vpop.f32.mrb[33].mxu0 }
 0x1d5   : > { %v2952_v33 = vadd.f32 %v719_v31, %v308_v24  ;;  %v320_v24 = vld [vmem:[%s2818_s11 + $0x1e8] sm:$0xff] }
 0x1d6   : > { %v1051_v36 = vmax.f32 %v1049_v3, %v2950_v28  ;;  %v317_v3 = vld [vmem:[%s2818_s11 + $0x1d0] sm:$0xff] }
 0x1d7   : > { %4467 = vst [vmem:[#allocation15_spill] sm:$0xff] %v2952_v33  ;;  %v1088_v39 = vmax.f32 %v1086_v11, %v2952_v33  ;;  %v723_v41 = vpop.f32.mrb[34].mxu0 }
 0x1d8   : > { %v2958_v44 = vadd.f32 %v723_v41, %v310_v34  ;;  %v725_v46 = vpop.f32.mrb[35].mxu0  ;;  %v319_v34 = vld [vmem:[%s2818_s11 + $0x1e0] sm:$0xff] }
 0x1d9   : > { %v2960_v47 = vadd.f32 %v725_v46, %v311_v38 }
 0x1da   : > { %v1052_v49 = vmax.f32 %v1050_v23, %v2958_v44 }
 0x1db   : > { %4468 = vst [vmem:[#allocation16_spill] sm:$0xff] %v2960_v47  ;;  %v1089_v55 = vmax.f32 %v1087_v25, %v2960_v47  ;;  %v729_v56 = vpop.f32.mrb[36].mxu0 }
 0x1dc   : > { %v2966_v57 = vadd.f32 %v729_v56, %v313_v48  ;;  %v731_v58 = vpop.f32.mrb[37].mxu0 }
 0x1dd   : > { %v2968_v60 = vadd.f32 %v731_v58, %v314_v52 }
 0x1de   : > { %v1053_v1 = vmax.f32 %v1051_v36, %v2966_v57  ;;  %v322_v36 = vld [vmem:[%s2818_s11 + $0x1f8] sm:$0xff] }
 0x1df   : > { %4469 = vst [vmem:[#allocation17_spill] sm:$0xff] %v2968_v60  ;;  %v1090_v7 = vmax.f32 %v1088_v39, %v2968_v60  ;;  %v735_v11 = vpop.f32.mrb[38].mxu0  ;;  %v323_v39 = vld [vmem:[%s2818_s11 + $0x200] sm:$0xff] }
 0x1e0   : > { %v2974_v12 = vadd.f32 %v735_v11, %v316_v63  ;;  %v737_v14 = vpop.f32.mrb[39].mxu0 }
 0x1e1   : > { %v2976_v19 = vadd.f32 %v737_v14, %v317_v3 }
 0x1e2   : > { %v1054_v23 = vmax.f32 %v1052_v49, %v2974_v12 }
 0x1e3   : > { %4470 = vst [vmem:[#allocation18_spill] sm:$0xff] %v2976_v19  ;;  %v1091_v25 = vmax.f32 %v1089_v55, %v2976_v19  ;;  %v741_v26 = vpop.f32.mrb[40].mxu0  ;;  %v325_v55 = vld [vmem:[%s2818_s11 + $0x210] sm:$0xff] }
 0x1e4   : > { %v743_v31 = vpop.f32.mrb[41].mxu0  ;;  %v2987_v48 = vadd.f32 %v741_v26, %v319_v34  ;;  %v329_v34 = vld [vmem:[%s2818_s11 + $0x230] sm:$0xff] }
 0x1e5   : > { %v2982_v38 = vadd.f32 %v743_v31, %v320_v24  ;;  %v328_v24 = vld [vmem:[%s2818_s11 + $0x228] sm:$0xff]  ;;  %v326_v31 = vld [vmem:[%s2818_s11 + $0x218] sm:$0xff] }
 0x1e6   : > { %v1055_v11 = vmax.f32 %v1053_v1, %v2987_v48 }
 0x1e7   : > { %4471 = vst [vmem:[#allocation19_spill] sm:$0xff] %v2982_v38  ;;  %v1092_v41 = vmax.f32 %v1090_v7, %v2982_v38  ;;  %v747_v46 = vpop.f32.mrb[42].mxu0 }
 0x1e8   : > { %v2989_v52 = vadd.f32 %v747_v46, %v322_v36  ;;  %v749_v49 = vpop.f32.mrb[43].mxu0 }
 0x1e9   : > { %v2991_v56 = vadd.f32 %v749_v49, %v323_v39  ;;  %v331_v49 = vld [vmem:[%s2818_s11 + $0x240] sm:$0xff] }
 0x1ea   : > { %v1056_v58 = vmax.f32 %v1054_v23, %v2989_v52 }
 0x1eb   : > { %4472 = vst [vmem:[#allocation20_spill] sm:$0xff] %v2991_v56  ;;  %v1093_v63 = vmax.f32 %v1091_v25, %v2991_v56  ;;  %v753_v3 = vpop.f32.mrb[44].mxu0 }
 0x1ec   : > { %v2997_v7 = vadd.f32 %v753_v3, %v325_v55  ;;  %v755_v14 = vpop.f32.mrb[45].mxu0  ;;  %v332_v55 = vld [vmem:[%s2818_s11 + $0x248] sm:$0xff] }
 0x1ed   : > { %v3005_v46 = vadd.f32 %v755_v14, %v326_v31  ;;  %v334_v14 = vld [vmem:[%s2818_s11 + $0x258] sm:$0xff] }
 0x1ee   : > { %v1057_v26 = vmax.f32 %v1055_v11, %v2997_v7 }
 0x1ef   : > { %v759_v36 = vpop.f32.mrb[46].mxu0  ;;  %4473 = vst [vmem:[#allocation21_spill] sm:$0xff] %v3005_v46 }
 0x1f0   : > { %v3003_v39 = vadd.f32 %v759_v36, %v328_v24  ;;  %v761_v23 = vpop.f32.mrb[47].mxu0  ;;  %v1094_v24 = vmax.f32 %v1092_v41, %v3005_v46 }
 0x1f1   : > { %v3007_v25 = vadd.f32 %v761_v23, %v329_v34  ;;  %v335_v34 = vld [vmem:[%s2818_s11 + $0x260] sm:$0xff] }
 0x1f2   : > { %v1058_v1 = vmax.f32 %v1056_v58, %v3003_v39 }
 0x1f3   : > { %4474 = vst [vmem:[#allocation22_spill] sm:$0xff] %v3007_v25  ;;  %v1095_v3 = vmax.f32 %v1093_v63, %v3007_v25  ;;  %v765_v11 = vpop.f32.mrb[48].mxu0 }
 0x1f4   : > { %v3013_v2 = vadd.f32 %v765_v11, %v331_v49  ;;  %v767_v56 = vpop.f32.mrb[49].mxu0  ;;  %v337_v49 = vld [vmem:[%s2818_s11 + $0x270] sm:$0xff] }
 0x1f5   : > { %v3016_v36 = vadd.f32 %v767_v56, %v332_v55  ;;  %v338_v56 = vld [vmem:[%s2818_s11 + $0x278] sm:$0xff] }
 0x1f6   : > { %v1059_v31 = vmax.f32 %v1057_v26, %v3013_v2 }
 0x1f7   : > { %4475 = vst [vmem:[#allocation23_spill] sm:$0xff] %v3016_v36  ;;  %v1096_v58 = vmax.f32 %v1094_v24, %v3016_v36  ;;  %v771_v23 = vpop.f32.mrb[50].mxu0  ;;  %v340_v24 = vld [vmem:[%s2818_s11 + $0x288] sm:$0xff] }
 0x1f8   : > { %v3022_v38 = vadd.f32 %v771_v23, %v334_v14  ;;  %v773_v63 = vpop.f32.mrb[51].mxu0 }
 0x1f9   : > { %v3024_v25 = vadd.f32 %v773_v63, %v335_v34  ;;  %v341_v34 = vld [vmem:[%s2818_s11 + $0x290] sm:$0xff] }
 0x1fa   : > { %v1060_v41 = vmax.f32 %v1058_v1, %v3022_v38 }
 0x1fb   : > { %4476 = vst [vmem:[#allocation24_spill] sm:$0xff] %v3024_v25  ;;  %v1097_v55 = vmax.f32 %v1095_v3, %v3024_v25  ;;  %v777_v11 = vpop.f32.mrb[52].mxu0  ;;  %v343_v3 = vld [vmem:[%s2818_s11 + $0x2a0] sm:$0xff] }
 0x1fc   : > { %v3030_v26 = vadd.f32 %v777_v11, %v337_v49  ;;  %v779_v46 = vpop.f32.mrb[53].mxu0 }
 0x1fd   : > { %v3032_v19 = vadd.f32 %v779_v46, %v338_v56  ;;  %v344_v46 = vld [vmem:[%s2818_s11 + $0x2a8] sm:$0xff] }
 0x1fe   : > { %v1061_v14 = vmax.f32 %v1059_v31, %v3030_v26 }
 0x1ff   : > { %4477 = vst [vmem:[#allocation25_spill] sm:$0xff] %v3032_v19  ;;  %v1098_v23 = vmax.f32 %v1096_v58, %v3032_v19  ;;  %v783_v63 = vpop.f32.mrb[54].mxu0  ;;  %v346_v58 = vld [vmem:[%s2818_s11 + $0x2b8] sm:$0xff] }
 0x200   : > { %v3038_v1 = vadd.f32 %v783_v63, %v340_v24  ;;  %v785_v36 = vpop.f32.mrb[55].mxu0 }
 0x201   : > { %v3040_v60 = vadd.f32 %v785_v36, %v341_v34  ;;  %v347_v36 = vld [vmem:[%s2818_s11 + $0x2c0] sm:$0xff] }
 0x202   : > { %v1062_v49 = vmax.f32 %v1060_v41, %v3038_v1 }
 0x203   : > { %4478 = vst [vmem:[#allocation26_spill] sm:$0xff] %v3040_v60  ;;  %v1099_v56 = vmax.f32 %v1097_v55, %v3040_v60  ;;  %v789_v11 = vpop.f32.mrb[56].mxu0  ;;  %v349_v55 = vld [vmem:[%s2818_s11 + $0x2d0] sm:$0xff] }
 0x204   : > { %v3046_v31 = vadd.f32 %v789_v11, %v343_v3  ;;  %v791_v25 = vpop.f32.mrb[57].mxu0  ;;  %v350_v11 = vld [vmem:[%s2818_s11 + $0x2d8] sm:$0xff] }
 0x205   : > { %v3048_v47 = vadd.f32 %v791_v25, %v344_v46 }
 0x206   : > { %v1063_v24 = vmax.f32 %v1061_v14, %v3046_v31 }
 0x207   : > { %4479 = vst [vmem:[#allocation27_spill] sm:$0xff] %v3048_v47  ;;  %v1100_v34 = vmax.f32 %v1098_v23, %v3048_v47  ;;  %v795_v63 = vpop.f32.mrb[0].mxu1  ;;  %v352_v23 = vld [vmem:[%s2818_s11 + $0x2e8] sm:$0xff] }
 0x208   : > { %v3054_v41 = vadd.f32 %v795_v63, %v346_v58  ;;  %v797_v19 = vpop.f32.mrb[1].mxu1 }
 0x209   : > { %v3056_v33 = vadd.f32 %v797_v19, %v347_v36  ;;  %v353_v19 = vld [vmem:[%s2818_s11 + $0x2f0] sm:$0xff] }
 0x20a   : > { %v1064_v3 = vmax.f32 %v1062_v49, %v3054_v41 }
 0x20b   : > { %4480 = vst [vmem:[#allocation28_spill] sm:$0xff] %v3056_v33  ;;  %v1101_v25 = vmax.f32 %v1099_v56, %v3056_v33  ;;  %v801_v46 = vpop.f32.mrb[2].mxu1 }
 0x20c   : > { %v3062_v60 = vadd.f32 %v801_v46, %v349_v55  ;;  %v803_v14 = vpop.f32.mrb[3].mxu1 }
 0x20d   : > { %v3064_v15 = vadd.f32 %v803_v14, %v350_v11  ;;  %v264_v11 = vld [vmem:[%s2818_s11 + $0x28] sm:$0xff] }
 0x20e   : > { %v1065_v58 = vmax.f32 %v1063_v24, %v3062_v60  ;;  %v261_v24 = vld [vmem:[%s2818_s11 + $0x10] sm:$0xff] }
 0x20f   : > { %4481 = vst [vmem:[#allocation29_spill] sm:$0xff] %v3064_v15  ;;  %v1102_v36 = vmax.f32 %v1100_v34, %v3064_v15  ;;  %v807_v49 = vpop.f32.mrb[4].mxu1 }
 0x210   : > { %v3070_v63 = vadd.f32 %v807_v49, %v352_v23  ;;  %v809_v47 = vpop.f32.mrb[5].mxu1  ;;  %v267_v23 = vld [vmem:[%s2818_s11 + $0x40] sm:$0xff] }
 0x211   : > { %v3072_v56 = vadd.f32 %v809_v47, %v353_v19 }
 0x212   : > { %v1066_v55 = vmax.f32 %v1064_v3, %v3070_v63 }
 0x213   : > { %v1103_v46 = vmax.f32 %v1101_v25, %v3072_v56  ;;  %v2053_v14 = vpop.f32.mrb[6].mxu1 }
 0x214   : > { %v1067_v33 = vmax.f32 %v1065_v58, %v1066_v55  ;;  %v878_v0 = vpop.f32.mrb[7].mxu1  ;;  %v3079_v15 = vadd.f32 %v2053_v14, %v264_v11 }
 0x215   : > { %v1104_v54 = vmax.f32 %v1102_v36, %v1103_v46  ;;  %v3082_v47 = vadd.f32 %v878_v0, %v261_v24  ;;  %v273_v0 = vld [vmem:[%s2818_s11 + $0x70] sm:$0xff] }
 0x216   : > { %v1068_v34 = vrot.slane %v1067_v33, 4  ;;  %4482 = vst [vmem:[#allocation30_spill] sm:$0xff] %v3079_v15  ;;  %v1113_v46 = vsel %vm1111_vm2, %v3079_v15, -inf }
 0x217   : > { %v1105_v49 = vrot.slane %v1104_v54, 4  ;;  %4483 = vst [vmem:[#allocation31_spill] sm:$0xff] %v3082_v47  ;;  %v2056_v3 = vpop.f32.mrb[8].mxu1 }
 0x218   : > { %v1069_v19 = vmax.f32 %v1067_v33, %v1068_v34  ;;  %v3084_v25 = vadd.f32 %v2056_v3, %v270_v42  ;;  %v888_v32 = vpop.f32.mrb[9].mxu1  ;;  %v1112_v42 = vsel %vm1111_vm2, %v3082_v47, -inf }
 0x219   : > { %v1106_v58 = vmax.f32 %v1104_v54, %v1105_v49  ;;  %v3086_v55 = vadd.f32 %v888_v32, %v267_v23 }
 0x21a   : > { %4484 = vst [vmem:[#allocation32_spill] sm:$0xff] %v3084_v25  ;;  %v1070_v36 = vrot.slane %v1069_v19, 2  ;;  %v1116_v11 = vsel %vm1111_vm2, %v3084_v25, -inf }
 0x21b   : > { %4485 = vst [vmem:[#allocation33_spill] sm:$0xff] %v3086_v55  ;;  %v1107_v14 = vrot.slane %v1106_v58, 2  ;;  %v1117_v33 = vmax.f32 %v1113_v46, %v1116_v11  ;;  %v1114_v32 = vsel %vm1111_vm2, %v3086_v55, -inf  ;;  %v2059_v54 = vpop.f32.mrb[10].mxu1 }
 0x21c   : > { %v1071_v24 = vmax.f32 %v1069_v19, %v1070_v36  ;;  %v1115_v34 = vmax.f32 %v1112_v42, %v1114_v32  ;;  %v3098_v23 = vadd.f32 %v2059_v54, %v276_v22  ;;  %v898_v49 = vpop.f32.mrb[11].mxu1 }
 0x21d   : > { %v1108_v3 = vmax.f32 %v1106_v58, %v1107_v14  ;;  %v3100_v15 = vadd.f32 %v898_v49, %v273_v0 }
 0x21e   : > { %4486 = vst [vmem:[#allocation34_spill] sm:$0xff] %v3098_v23  ;;  %v1072_v25 = vrot.slane %v1071_v24, 1  ;;  %v1120_v9 = vsel %vm1111_vm2, %v3098_v23, -inf  ;;  %v4500_v23 = vld [vmem:[#allocation10_spill] sm:$0xff] }
 0x21f   : > { %4487 = vst [vmem:[#allocation35_spill] sm:$0xff] %v3100_v15  ;;  %v1109_v47 = vrot.slane %v1108_v3, 1  ;;  %v3106_v46 = vmax.f32 %v1117_v33, %v1120_v9  ;;  %v1118_v11 = vsel %vm1111_vm2, %v3100_v15, -inf  ;;  %v2062_v19 = vpop.f32.mrb[12].mxu1  ;;  %v4498_v33 = vld [vmem:[#allocation8_spill] sm:$0xff]  ;;  %v4499_v9 = vld [vmem:[#allocation9_spill] sm:$0xff] }
 0x220   : > { %v3110_v36 = vmax.f32 %v1071_v24, %v1072_v25  ;;  %v3112_v22 = vmax.f32 %v1115_v34, %v1118_v11  ;;  %v908_v58 = vpop.f32.mrb[13].mxu1  ;;  %v3116_v14 = vadd.f32 %v2062_v19, %v282_v61 }
 0x221   : > { %4488 = vst [vmem:[#allocation36_spill] sm:$0xff] %v3106_v46  ;;  %v3114_v0 = vmax.f32 %v1108_v3, %v1109_v47  ;;  %v3118_v42 = vadd.f32 %v908_v58, %v279_v53  ;;  %v4497_v3 = vld [vmem:[#allocation7_spill] sm:$0xff] }
 0x222   : > { %4489 = vst [vmem:[#allocation37_spill] sm:$0xff] %v3112_v22  ;;  %4490 = vst [vmem:[#allocation38_spill] sm:$0xff] %v3116_v14  ;;  %v1274_v32 = vsub.f32 %v3070_v63, %v3110_v36  ;;  %v4517_v63 = vld [vmem:[#allocation24_spill] sm:$0xff]  ;;  %v4525_v14 = vsub.f32 %v2826_v6, %v3110_v36  ;;  %v4527_v47 = vsub.f32 %v2842_v18, %v3110_v36 }
 0x223   : > { %4491 = vst [vmem:[#allocation39_spill] sm:$0xff] %v3118_v42  ;;  %v3136_v54 = vpop.f32.mrb[14].mxu1  ;;  %v1275_v53 = vsub.f32 %v3072_v56, %v3114_v0  ;;  %v288_v56 = vld [vmem:[%s2818_s11 + $0xe8] sm:$0xff]  ;;  %v4524_v42 = vsub.f32 %v2840_v17, %v3110_v36  ;;  %v4528_v22 = vsub.f32 %v2854_v27, %v3110_v36  ;;  %v4531_v6 = vsub.f32 %v2870_v43, %v3110_v36 }
 0x224   : > { %v1463_v24 = vmul.f32 1.442695, %v1274_v32  ;;  %v3144_v11 = vpop.f32.mrb[15].mxu1  ;;  %v4501_v32 = vld [vmem:[#allocation11_spill] sm:$0xff]  ;;  %v4536_v43 = vsub.f32 %v2910_v30, %v3110_v36  ;;  %v4541_v30 = vsub.f32 %v2942_v13, %v3110_v36  ;;  %v4546_v13 = vsub.f32 %v2987_v48, %v3110_v36 }
 0x225   : > { %v1465_v58 = vmul.f32 1.442695, %v1275_v53  ;;  %v1283_v19 = vmul.f32 1.442695, %v4524_v42  ;;  %v3278_v53 = vadd.f32 %v3136_v54, %v288_v56  ;;  %v4532_v54 = vsub.f32 %v2878_v51, %v3110_v36 }
 0x226   : > { %2262 = vpow2.f32 %v1463_v24  ;;  %v4495_v24 = vld [vmem:[#allocation6_spill] sm:$0xff]  ;;  %v1343_v56 = vmul.f32 1.442695, %v4536_v43  ;;  %v4537_v51 = vsub.f32 %v2918_v40, %v3110_v36  ;;  %v4550_v48 = vsub.f32 %v3013_v2, %v3110_v36 }
 0x227   : > { %v3168_v34 = vpop.f32.mrb[16].mxu1  ;;  %2264 = vpow2.f32 %v1465_v58  ;;  %v4523_v58 = vsub.f32 %v2824_v5, %v3110_v36  ;;  %4526 = vst [vmem:[#allocation10_spill] sm:$0xff] %v3278_v53  ;;  %v1301_v5 = vmul.f32 1.442695, %v4528_v22  ;;  %v1319_v18 = vmul.f32 1.442695, %v4532_v54 }
 0x228   : > { %4492 = vst [vmem:[#allocation40_spill] sm:$0xff] %v3168_v34  ;;  %v3178_v49 = vpop.f32.mrb[17].mxu1  ;;  %v1367_v54 = vmul.f32 1.442695, %v4541_v30  ;;  %v4554_v2 = vsub.f32 %v3046_v31, %v3110_v36  ;;  %v4558_v31 = vsub.f32 %v2844_v20, %v3114_v0 }
 0x229   : > { %4493 = vst [vmem:[#allocation41_spill] sm:$0xff] %v3178_v49  ;;  %v4520_v49 = vld [vmem:[#allocation27_spill] sm:$0xff]  ;;  %v1277_v55 = vmul.f32 1.442695, %v4523_v58  ;;  %v4529_v58 = vsub.f32 %v2862_v35, %v3110_v36  ;;  %v4534_v35 = vsub.f32 %v2894_v4, %v3110_v36  ;;  %v4539_v4 = vsub.f32 %v2934_v62, %v3110_v36 }
 0x22a   : > { %v4544_v62 = vsub.f32 %v2966_v57, %v3110_v36  ;;  %v4548_v57 = vsub.f32 %v2997_v7, %v3110_v36  ;;  %v4552_v7 = vsub.f32 %v3030_v26, %v3110_v36  ;;  %v3383_v30 = vmul.f32 1.442695, %v4554_v2 }
 0x22b   : > { %v3204_v61 = vpop.f32.mrb[18].mxu1  ;;  %v1307_v17 = vmul.f32 1.442695, %v4529_v58  ;;  %2266 = vpow2.f32 %v1277_v55  ;;  %v1331_v22 = vmul.f32 1.442695, %v4534_v35  ;;  %v4556_v26 = vsub.f32 %v3062_v60, %v3110_v36 }
 0x22c   : > { %4494 = vst [vmem:[#allocation42_spill] sm:$0xff] %v3204_v61  ;;  %v3212_v25 = vpop.f32.mrb[19].mxu1  ;;  %v1289_v61 = vmul.f32 1.442695, %v4525_v14  ;;  %v1313_v14 = vmul.f32 1.442695, %v4531_v6  ;;  %2268 = vpow2.f32 %v1283_v19  ;;  %v4542_v19 = vsub.f32 %v2950_v28, %v3110_v36 }
 0x22d   : > { %4496 = vst [vmem:[#allocation6_spill] sm:$0xff] %v3212_v25  ;;  %v285_v25 = vld [vmem:[%s2818_s11 + $0xd0] sm:$0xff]  ;;  %v1349_v58 = vmul.f32 1.442695, %v4537_v51  ;;  %v1361_v6 = vmul.f32 1.442695, %v4539_v4  ;;  %v4560_v60 = vsub.f32 %v2846_v21, %v3114_v0  ;;  %v4564_v21 = vsub.f32 %v4495_v24, %v3114_v0 }
 0x22e   : > { %v3290_v42 = vadd.f32 %v3144_v11, %v285_v25  ;;  %v4535_v25 = vsub.f32 %v2902_v16, %v3110_v36  ;;  %2270 = vpow2.f32 %v1289_v61  ;;  %v1373_v40 = vmul.f32 1.442695, %v4542_v19 }
 0x22f   : > { %v3236_v15 = vpop.f32.mrb[20].mxu1  ;;  %v3333_v35 = vmul.f32 1.442695, %v4544_v62  ;;  %v4545_v61 = vsub.f32 %v2974_v12, %v3110_v36  ;;  %v3343_v28 = vmul.f32 1.442695, %v4546_v13  ;;  %v4549_v12 = vsub.f32 %v3003_v39, %v3110_v36 }
 0x230   : > { %4508 = vst [vmem:[#allocation7_spill] sm:$0xff] %v3236_v15  ;;  %v3238_v46 = vpop.eup %2262  ;;  %v3249_v34 = vpop.f32.mrb[21].mxu1  ;;  %v4522_v15 = vld [vmem:[#allocation29_spill] sm:$0xff]  ;;  %4530 = vst [vmem:[#allocation11_spill] sm:$0xff] %v3290_v42  ;;  %v1337_v11 = vmul.f32 1.442695, %v4535_v25  ;;  %v4553_v39 = vsub.f32 %v3038_v1, %v3110_v36  ;;  %v4557_v1 = vsub.f32 %v2828_v8, %v3114_v0  ;;  %v4561_v8 = vsub.f32 %v2856_v29, %v3114_v0 }
 0x231   : > { %4509 = vst [vmem:[#allocation8_spill] sm:$0xff] %v3238_v46  ;;  %4514 = vst [vmem:[#allocation9_spill] sm:$0xff] %v3249_v34  ;;  %v4516_v46 = vld [vmem:[#allocation23_spill] sm:$0xff]  ;;  %v1295_v34 = vmul.f32 1.442695, %v4527_v47  ;;  %v4533_v47 = vsub.f32 %v2886_v59, %v3110_v36  ;;  %v4538_v59 = vsub.f32 %v2926_v50, %v3110_v36  ;;  %v3319_v16 = vpop.eup %2264 }
 0x232   : > { %4540 = vst [vmem:[#allocation23_spill] sm:$0xff] %v3319_v16  ;;  %v3338_v25 = vmul.f32 1.442695, %v4545_v61  ;;  %v3353_v43 = vmul.f32 1.442695, %v4548_v57 }
 0x233   : > { %v1325_v27 = vmul.f32 1.442695, %v4533_v47  ;;  %v1355_v55 = vmul.f32 1.442695, %v4538_v59  ;;  %v4543_v47 = vsub.f32 %v2958_v44, %v3110_v36  ;;  %2272 = vpow2.f32 %v1295_v34 }
 0x234   : > { %2274 = vpow2.f32 %v1301_v5  ;;  %v4547_v44 = vsub.f32 %v2989_v52, %v3110_v36  ;;  %v3358_v51 = vmul.f32 1.442695, %v4549_v12  ;;  %v3363_v5 = vmul.f32 1.442695, %v4550_v48 }
 0x235   : > { %v1379_v50 = vmul.f32 1.442695, %v4543_v47  ;;  %2276 = vpow2.f32 %v1307_v17  ;;  %v4551_v52 = vsub.f32 %v3022_v38, %v3110_v36  ;;  %v3373_v4 = vmul.f32 1.442695, %v4552_v7  ;;  %v3420_v20 = vpop.eup %2266 }
 0x236   : > { %v3348_v34 = vmul.f32 1.442695, %v4547_v44  ;;  %2278 = vpow2.f32 %v1313_v14  ;;  %v3378_v17 = vmul.f32 1.442695, %v4553_v39  ;;  %v4555_v38 = vsub.f32 %v3054_v41, %v3110_v36  ;;  %v3437_v29 = vpop.eup %2268  ;;  %v4570_v39 = vld [vmem:[#allocation12_spill] sm:$0xff] }
 0x237   : > { %v3368_v59 = vmul.f32 1.442695, %v4551_v52  ;;  %2280 = vpow2.f32 %v1319_v18  ;;  %v3393_v14 = vmul.f32 1.442695, %v4556_v26  ;;  %v3398_v47 = vmul.f32 1.442695, %v4557_v1 }
 0x238   : > { %v3388_v19 = vmul.f32 1.442695, %v4555_v38  ;;  %v3403_v62 = vmul.f32 1.442695, %v4558_v31  ;;  %2282 = vpow2.f32 %v1325_v27  ;;  %v4559_v41 = vsub.f32 %v2831_v10, %v3114_v0  ;;  %v3454_v24 = vpop.eup %2270  ;;  %v4574_v1 = vld [vmem:[#allocation14_spill] sm:$0xff] }
 0x239   : > { %v3413_v36 = vmul.f32 1.442695, %v4560_v60  ;;  %v3418_v61 = vmul.f32 1.442695, %v4561_v8  ;;  %2284 = vpow2.f32 %v1331_v22  ;;  %v4562_v27 = vsub.f32 %v2864_v37, %v3114_v0 }
 0x23a   : > { %v3408_v18 = vmul.f32 1.442695, %v4559_v41  ;;  %v4563_v10 = vsub.f32 %v2872_v45, %v3114_v0  ;;  %v3435_v57 = vmul.f32 1.442695, %v4564_v21  ;;  %2286 = vpow2.f32 %v1337_v11  ;;  %v4582_v21 = vld [vmem:[#allocation17_spill] sm:$0xff] }
 0x23b   : > { %v3425_v13 = vmul.f32 1.442695, %v4562_v27  ;;  %v4565_v22 = vsub.f32 %v4497_v3, %v3114_v0  ;;  %v4566_v37 = vsub.f32 %v4498_v33, %v3114_v0  ;;  %v4567_v45 = vsub.f32 %v4499_v9, %v3114_v0 }
 0x23c   : > { %v3430_v44 = vmul.f32 1.442695, %v4563_v10  ;;  %2288 = vpow2.f32 %v1343_v56  ;;  %v4568_v11 = vsub.f32 %v4500_v23, %v3114_v0  ;;  %v4569_v3 = vsub.f32 %v4501_v32, %v3114_v0  ;;  %v4572_v56 = vld [vmem:[#allocation13_spill] sm:$0xff]  ;;  %v4576_v32 = vld [vmem:[#allocation15_spill] sm:$0xff] }
 0x23d   : > { %v3442_v12 = vmul.f32 1.442695, %v4565_v22  ;;  %v3447_v48 = vmul.f32 1.442695, %v4566_v37  ;;  %v3452_v52 = vmul.f32 1.442695, %v4567_v45  ;;  %2290 = vpow2.f32 %v1349_v58  ;;  %v3471_v38 = vpop.eup %2272 }
 0x23e   : > { %v3459_v7 = vmul.f32 1.442695, %v4568_v11  ;;  %v3464_v33 = vmul.f32 1.442695, %v4569_v3  ;;  %v4571_v2 = vsub.f32 %v4570_v39, %v3114_v0  ;;  %2292 = vpow2.f32 %v1355_v55  ;;  %v3488_v8 = vpop.eup %2274  ;;  %v4579_v55 = vld [vmem:[#allocation16_spill] sm:$0xff]  ;;  %v4585_v45 = vld [vmem:[#allocation18_spill] sm:$0xff] }
 0x23f   : > { %v4573_v26 = vsub.f32 %v4572_v56, %v3114_v0  ;;  %v4575_v58 = vsub.f32 %v4574_v1, %v3114_v0  ;;  %v4577_v41 = vsub.f32 %v4576_v32, %v3114_v0  ;;  %2294 = vpow2.f32 %v1361_v6  ;;  %v3505_v39 = vpop.eup %2276  ;;  %v4594_v32 = vld [vmem:[#allocation21_spill] sm:$0xff] }
 0x240   : > { %v3469_v9 = vmul.f32 1.442695, %v4571_v2  ;;  %v4580_v27 = vsub.f32 %v4579_v55, %v3114_v0  ;;  %v4583_v22 = vsub.f32 %v4582_v21, %v3114_v0  ;;  %v4586_v11 = vsub.f32 %v4585_v45, %v3114_v0  ;;  %v4588_v2 = vld [vmem:[#allocation19_spill] sm:$0xff] }
 0x241   : > { %v3476_v23 = vmul.f32 1.442695, %v4573_v26  ;;  %v3481_v31 = vmul.f32 1.442695, %v4575_v58  ;;  %v3486_v60 = vmul.f32 1.442695, %v4577_v41  ;;  %2296 = vpow2.f32 %v1367_v54 }
 0x242   : > { %v3493_v10 = vmul.f32 1.442695, %v4580_v27  ;;  %v3498_v37 = vmul.f32 1.442695, %v4583_v22  ;;  %v3503_v3 = vmul.f32 1.442695, %v4586_v11  ;;  %v4589_v6 = vsub.f32 %v4588_v2, %v3114_v0  ;;  %v3522_v27 = vpop.eup %2278 }
 0x243   : > { %4578 = vst [vmem:[#allocation24_spill] sm:$0xff] %v3486_v60  ;;  %v4591_v26 = vld [vmem:[#allocation20_spill] sm:$0xff]  ;;  %v4595_v41 = vsub.f32 %v4594_v32, %v3114_v0  ;;  %2298 = vpow2.f32 %v1373_v40  ;;  %v4597_v54 = vld [vmem:[#allocation22_spill] sm:$0xff]  ;;  %v4600_v45 = vsub.f32 %v4516_v46, %v3114_v0  ;;  %v4602_v2 = vsub.f32 %v4517_v63, %v3114_v0  ;;  %v4604_v40 = vld [vmem:[#allocation25_spill] sm:$0xff] }
 0x244   : > { %4581 = vst [vmem:[#allocation27_spill] sm:$0xff] %v3493_v10  ;;  %4584 = vst [vmem:[#allocation29_spill] sm:$0xff] %v3498_v37  ;;  %v3510_v56 = vmul.f32 1.442695, %v4589_v6  ;;  %v4592_v1 = vsub.f32 %v4591_v26, %v3114_v0  ;;  %v4598_v21 = vsub.f32 %v4597_v54, %v3114_v0  ;;  %v294_v26 = vld [vmem:[%s2818_s11 + $0x118] sm:$0xff]  ;;  %2300 = vpow2.f32 %v1379_v50  ;;  %v4607_v54 = vld [vmem:[#allocation26_spill] sm:$0xff] }
 0x245   : > { %4587 = vst [vmem:[#allocation12_spill] sm:$0xff] %v3503_v3  ;;  %v3520_v55 = vmul.f32 1.442695, %v4595_v41  ;;  %v3532_v11 = vmul.f32 1.442695, %v4600_v45  ;;  %v4605_v32 = vsub.f32 %v4604_v40, %v3114_v0  ;;  %v4610_v45 = vsub.f32 %v4520_v49, %v3114_v0  ;;  %v4612_v50 = vld [vmem:[#allocation28_spill] sm:$0xff] }
 0x246   : > { %4590 = vst [vmem:[#allocation13_spill] sm:$0xff] %v3510_v56  ;;  %v3515_v58 = vmul.f32 1.442695, %v4592_v1  ;;  %v3527_v22 = vmul.f32 1.442695, %v4598_v21  ;;  %v3540_v1 = vpop.eup %2280  ;;  %v4608_v21 = vsub.f32 %v4607_v54, %v3114_v0  ;;  %2302 = vpow2.f32 %v3333_v35  ;;  %v4617_v35 = vld [vmem:[#allocation38_spill] sm:$0xff] }
 0x247   : > { %4596 = vst [vmem:[#allocation15_spill] sm:$0xff] %v3520_v55  ;;  %4601 = vst [vmem:[#allocation17_spill] sm:$0xff] %v3532_v11  ;;  %v3537_v6 = vmul.f32 1.442695, %v4602_v2  ;;  %v3545_v41 = vmul.f32 1.442695, %v4605_v32  ;;  %v3557_v2 = vpop.eup %2282  ;;  %v4613_v16 = vsub.f32 %v4612_v50, %v3114_v0  ;;  %v4615_v32 = vsub.f32 %v4522_v15, %v3114_v0 }
 0x248   : > { %4593 = vst [vmem:[#allocation14_spill] sm:$0xff] %v3515_v58  ;;  %4599 = vst [vmem:[#allocation16_spill] sm:$0xff] %v3527_v22  ;;  %v3550_v46 = vmul.f32 1.442695, %v4608_v21  ;;  %v3555_v63 = vmul.f32 1.442695, %v4610_v45  ;;  %v1613_v49 = vadd.f32 %v3437_v29, %v3420_v20  ;;  %2304 = vpow2.f32 %v3338_v25 }
 0x249   : > { %4603 = vst [vmem:[#allocation18_spill] sm:$0xff] %v3537_v6  ;;  %4606 = vst [vmem:[#allocation19_spill] sm:$0xff] %v3545_v41  ;;  %v3563_v40 = vmul.f32 1.442695, %v4613_v16  ;;  %v3568_v54 = vmul.f32 1.442695, %v4615_v32  ;;  %2306 = vpow2.f32 %v3343_v28 }
 0x24a   : > { %4609 = vst [vmem:[#allocation20_spill] sm:$0xff] %v3550_v46  ;;  %4611 = vst [vmem:[#allocation21_spill] sm:$0xff] %v3555_v63  ;;  %v291_v21 = vld [vmem:[%s2818_s11 + $0x100] sm:$0xff]  ;;  %v2077_v45 = vpop.f32.mrb[22].mxu1  ;;  %v3573_v63 = vpop.eup %2284  ;;  %v1124_v50 = vsel %vm1111_vm2, %v4617_v35, -inf  ;;  %v4618_v16 = vld [vmem:[#allocation39_spill] sm:$0xff]  ;;  %2308 = vpow2.f32 %v3348_v34 }
 0x24b   : > { %4614 = vst [vmem:[#allocation22_spill] sm:$0xff] %v3563_v40  ;;  %4616 = vst [vmem:[#allocation25_spill] sm:$0xff] %v3568_v54  ;;  %v1122_v40 = vsel %vm1111_vm2, %v4618_v16, -inf  ;;  %v1128_v15 = vsel %vm1111_vm2, %v3278_v53, -inf  ;;  %v3582_v0 = vpop.f32.mrb[23].mxu1  ;;  %v3584_v32 = vpop.eup %2286  ;;  %v1614_v54 = vadd.f32 %v3454_v24, %v1613_v49  ;;  %v4619_v46 = vld [vmem:[#allocation36_spill] sm:$0xff]  ;;  %2310 = vpow2.f32 %v3353_v43 }
 0x24c   : > { %v1125_v25 = vmax.f32 %v4619_v46, %v1124_v50  ;;  %v4620_v41 = vld [vmem:[#allocation37_spill] sm:$0xff]  ;;  %v300_v6 = vld [vmem:[%s2818_s11 + $0x148] sm:$0xff]  ;;  %v3591_v11 = vpop.f32.mrb[24].mxu1  ;;  %v3593_v16 = vpop.eup %2288  ;;  %v1126_v53 = vsel %vm1111_vm2, %v3290_v42, -inf  ;;  %v4621_v22 = vld [vmem:[#allocation40_spill] sm:$0xff]  ;;  %2312 = vpow2.f32 %v3358_v51 }
 0x24d   : > { %v1123_v35 = vmax.f32 %v4620_v41, %v1122_v40  ;;  %v3599_v28 = vadd.f32 %v4621_v22, %v294_v26  ;;  %v4623_v49 = vld [vmem:[#allocation41_spill] sm:$0xff]  ;;  %v3604_v46 = vpop.f32.mrb[25].mxu1  ;;  %v3606_v41 = vpop.eup %2290  ;;  %v1615_v40 = vadd.f32 %v3471_v38, %v1614_v54  ;;  %v297_v58 = vld [vmem:[%s2818_s11 + $0x130] sm:$0xff]  ;;  %v4625_v43 = vld [vmem:[#allocation42_spill] sm:$0xff]  ;;  %2314 = vpow2.f32 %v3363_v5 }
 0x24e   : > { %v3602_v55 = vadd.f32 %v4623_v49, %v291_v21  ;;  %v1129_v50 = vmax.f32 %v1125_v25, %v1128_v15  ;;  %v306_v42 = vld [vmem:[%s2818_s11 + $0x178] sm:$0xff]  ;;  %v3612_v56 = vpop.f32.mrb[26].mxu1  ;;  %v3614_v22 = vpop.eup %2292  ;;  %v3622_v49 = vadd.f32 %v4625_v43, %v300_v6  ;;  %v303_v54 = vld [vmem:[%s2818_s11 + $0x160] sm:$0xff]  ;;  %v312_v3 = vld [vmem:[%s2818_s11 + $0x1a8] sm:$0xff]  ;;  %2316 = vpow2.f32 %v3368_v59 }
 0x24f   : > { %4622 = vst [vmem:[#allocation26_spill] sm:$0xff] %v3599_v28  ;;  %v1127_v34 = vmax.f32 %v1123_v35, %v1126_v53  ;;  %v1132_v26 = vsel %vm1111_vm2, %v3599_v28, -inf  ;;  %v3625_v53 = vpop.f32.mrb[27].mxu1  ;;  %v3627_v35 = vpop.eup %2294  ;;  %v1616_v15 = vadd.f32 %v3488_v8, %v1615_v40  ;;  %v4627_v43 = vld [vmem:[#allocation6_spill] sm:$0xff]  ;;  %v4629_v10 = vld [vmem:[#allocation7_spill] sm:$0xff]  ;;  %2318 = vpow2.f32 %v3373_v4  ;;  %v4631_v59 = vld [vmem:[#allocation9_spill] sm:$0xff] }
 0x250   : > { %4624 = vst [vmem:[#allocation28_spill] sm:$0xff] %v3602_v55  ;;  %v1130_v21 = vsel %vm1111_vm2, %v3602_v55, -inf  ;;  %4626 = vst [vmem:[#allocation36_spill] sm:$0xff] %v3622_v49  ;;  %v1133_v51 = vmax.f32 %v1129_v50, %v1132_v26  ;;  %v3632_v28 = vpop.f32.mrb[28].mxu1  ;;  %v3634_v37 = vpop.eup %2296  ;;  %v1136_v6 = vsel %vm1111_vm2, %v3622_v49, -inf  ;;  %v3640_v55 = vadd.f32 %v4627_v43, %v297_v58  ;;  %v309_v49 = vld [vmem:[%s2818_s11 + $0x190] sm:$0xff] }
 0x251   : > { %v1131_v25 = vmax.f32 %v1127_v34, %v1130_v21  ;;  %v3643_v5 = vadd.f32 %v4629_v10, %v306_v42  ;;  %v3645_v40 = vpop.f32.mrb[29].mxu1  ;;  %v3647_v50 = vpop.eup %2298  ;;  %v1617_v34 = vadd.f32 %v3505_v39, %v1616_v15  ;;  %v3652_v21 = vadd.f32 %v4631_v59, %v303_v54  ;;  %v318_v43 = vld [vmem:[%s2818_s11 + $0x1d8] sm:$0xff] }
 0x252   : > { %4628 = vst [vmem:[#allocation37_spill] sm:$0xff] %v3640_v55  ;;  %v1137_v26 = vmax.f32 %v1133_v51, %v1136_v6  ;;  %v3655_v60 = vpop.f32.mrb[30].mxu1  ;;  %v3657_v58 = vpop.eup %2300  ;;  %2320 = vpow2.f32 %v3378_v17  ;;  %v1134_v42 = vsel %vm1111_vm2, %v3640_v55, -inf  ;;  %v3664_v10 = vadd.f32 %v2077_v45, %v312_v3 }
 0x253   : > { %4630 = vst [vmem:[#allocation40_spill] sm:$0xff] %v3643_v5  ;;  %4632 = vst [vmem:[#allocation41_spill] sm:$0xff] %v3652_v21  ;;  %v1140_v4 = vsel %vm1111_vm2, %v3643_v5, -inf  ;;  %v3666_v15 = vpop.f32.mrb[31].mxu1  ;;  %v3668_v54 = vpop.eup %2302  ;;  %2322 = vpow2.f32 %v3383_v30  ;;  %v1618_v51 = vadd.f32 %v3522_v27, %v1617_v34  ;;  %v1135_v6 = vmax.f32 %v1131_v25, %v1134_v42  ;;  %v315_v34 = vld [vmem:[%s2818_s11 + $0x1c0] sm:$0xff]  ;;  %v324_v5 = vld [vmem:[%s2818_s11 + $0x208] sm:$0xff] }
 0x254   : > { %4633 = vst [vmem:[#allocation42_spill] sm:$0xff] %v3664_v10  ;;  %v1141_v17 = vmax.f32 %v1137_v26, %v1140_v4  ;;  %v3673_v59 = vpop.f32.mrb[32].mxu1  ;;  %v3675_v55 = vpop.eup %2304  ;;  %2324 = vpow2.f32 %v3388_v19  ;;  %v1138_v3 = vsel %vm1111_vm2, %v3652_v21, -inf  ;;  %v1144_v45 = vsel %vm1111_vm2, %v3664_v10, -inf }
 0x255   : > { %4634 = vst [vmem:[#allocation6_spill] sm:$0xff] %v3675_v55  ;;  %v3683_v30 = vadd.f32 %v3582_v0, %v309_v49  ;;  %v3686_v25 = vpop.f32.mrb[33].mxu1  ;;  %v3688_v26 = vpop.eup %2306  ;;  %2326 = vpow2.f32 %v3393_v14  ;;  %v1619_v42 = vadd.f32 %v3540_v1, %v1618_v51  ;;  %v1139_v19 = vmax.f32 %v1135_v6, %v1138_v3 }
 0x256   : > { %v1145_v4 = vmax.f32 %v1141_v17, %v1144_v45  ;;  %v3693_v21 = vpop.f32.mrb[34].mxu1  ;;  %v3695_v55 = vpop.eup %2308  ;;  %2328 = vpow2.f32 %v3398_v47  ;;  %v3703_v14 = vadd.f32 %v3591_v11, %v318_v43  ;;  %v3712_v47 = vadd.f32 %v3604_v46, %v315_v34  ;;  %v321_v45 = vld [vmem:[%s2818_s11 + $0x1f0] sm:$0xff] }
 0x257   : > { %4635 = vst [vmem:[#allocation7_spill] sm:$0xff] %v3683_v30  ;;  %v1142_v0 = vsel %vm1111_vm2, %v3683_v30, -inf  ;;  %v3705_v51 = vpop.f32.mrb[35].mxu1  ;;  %v3707_v6 = vpop.eup %2310  ;;  %2330 = vpow2.f32 %v3403_v62  ;;  %v1620_v17 = vadd.f32 %v3557_v2, %v1619_v42  ;;  %v3725_v43 = vadd.f32 %v3612_v56, %v324_v5 }
 0x258   : > { %4636 = vst [vmem:[#allocation9_spill] sm:$0xff] %v3703_v14  ;;  %v1143_v3 = vmax.f32 %v1139_v19, %v1142_v0  ;;  %4637 = vst [vmem:[#allocation43_spill] sm:$0xff] %v3712_v47  ;;  %v3715_v10 = vpop.f32.mrb[36].mxu1  ;;  %v3717_v49 = vpop.eup %2312  ;;  %2332 = vpow2.f32 %v3408_v18  ;;  %v1148_v11 = vsel %vm1111_vm2, %v3703_v14, -inf  ;;  %v1146_v18 = vsel %vm1111_vm2, %v3712_v47, -inf  ;;  %v330_v0 = vld [vmem:[%s2818_s11 + $0x238] sm:$0xff] }
 0x259   : > { %v3727_v42 = vpop.f32.mrb[37].mxu1  ;;  %v3729_v46 = vpop.eup %2314  ;;  %2334 = vpow2.f32 %v3413_v36  ;;  %v1621_v34 = vadd.f32 %v3573_v63, %v1620_v17  ;;  %v1149_v19 = vmax.f32 %v1145_v4, %v1148_v11  ;;  %v327_v14 = vld [vmem:[%s2818_s11 + $0x220] sm:$0xff]  ;;  %v1152_v5 = vsel %vm1111_vm2, %v3725_v43, -inf  ;;  %v336_v47 = vld [vmem:[%s2818_s11 + $0x268] sm:$0xff] }
 0x25a   : > { %v3737_v30 = vpop.eup %2316  ;;  %2336 = vpow2.f32 %v3418_v61  ;;  %v1147_v56 = vmax.f32 %v1143_v3, %v1146_v18  ;;  %v3743_v62 = vadd.f32 %v3625_v53, %v321_v45  ;;  %v3758_v3 = vadd.f32 %v3632_v28, %v330_v0 }
 0x25b   : > { %v3745_v36 = vpop.eup %2318  ;;  %2338 = vpow2.f32 %v3425_v13  ;;  %v1622_v4 = vadd.f32 %v3584_v32, %v1621_v34  ;;  %v1153_v17 = vmax.f32 %v1149_v19, %v1152_v5  ;;  %v3761_v13 = vadd.f32 %v3645_v40, %v327_v14 }
 0x25c   : > { %v3752_v61 = vpop.eup %2320  ;;  %2340 = vpow2.f32 %v3430_v44  ;;  %v1150_v53 = vsel %vm1111_vm2, %v3743_v62, -inf  ;;  %v333_v44 = vld [vmem:[%s2818_s11 + $0x250] sm:$0xff]  ;;  %v1156_v28 = vsel %vm1111_vm2, %v3758_v3, -inf  ;;  %v3778_v14 = vadd.f32 %v3655_v60, %v336_v47 }
 0x25d   : > { %v3763_v45 = vpop.eup %2322  ;;  %2342 = vpow2.f32 %v3435_v57  ;;  %v1623_v34 = vadd.f32 %v3593_v16, %v1622_v4  ;;  %v1151_v19 = vmax.f32 %v1147_v56, %v1150_v53  ;;  %v1154_v40 = vsel %vm1111_vm2, %v3761_v13, -inf  ;;  %v342_v57 = vld [vmem:[%s2818_s11 + $0x298] sm:$0xff] }
 0x25e   : > { %4638 = vst [vmem:[#allocation44_spill] sm:$0xff] %v3763_v45  ;;  %v3770_v5 = vpop.eup %2324  ;;  %2344 = vpow2.f32 %v3442_v12  ;;  %v1157_v4 = vmax.f32 %v1153_v17, %v1156_v28  ;;  %v1160_v18 = vsel %vm1111_vm2, %v3778_v14, -inf  ;;  %v3789_v11 = vadd.f32 %v3666_v15, %v333_v44  ;;  %v339_v28 = vld [vmem:[%s2818_s11 + $0x280] sm:$0xff] }
 0x25f   : > { %4639 = vst [vmem:[#allocation45_spill] sm:$0xff] %v3770_v5  ;;  %v3781_v0 = vpop.eup %2326  ;;  %2346 = vpow2.f32 %v3447_v48  ;;  %v1624_v56 = vadd.f32 %v3606_v41, %v1623_v34  ;;  %v1155_v53 = vmax.f32 %v1151_v19, %v1154_v40  ;;  %v3796_v34 = vadd.f32 %v3673_v59, %v342_v57 }
 0x260   : > { %4640 = vst [vmem:[#allocation46_spill] sm:$0xff] %v3781_v0  ;;  %v2329_v12 = vpop.eup %2328  ;;  %2348 = vpow2.f32 %v3452_v52  ;;  %v1161_v17 = vmax.f32 %v1157_v4, %v1160_v18  ;;  %v1158_v44 = vsel %vm1111_vm2, %v3789_v11, -inf  ;;  %v348_v18 = vld [vmem:[%s2818_s11 + $0x2c8] sm:$0xff] }
 0x261   : > { %v2331_v47 = vpop.eup %2330  ;;  %2350 = vpow2.f32 %v3459_v7  ;;  %v1625_v48 = vadd.f32 %v3614_v22, %v1624_v56  ;;  %v1159_v56 = vmax.f32 %v1155_v53, %v1158_v44  ;;  %v1164_v59 = vsel %vm1111_vm2, %v3796_v34, -inf }
 0x262   : > { %v2333_v52 = vpop.eup %2332  ;;  %2352 = vpow2.f32 %v3464_v33  ;;  %v1650_v19 = vadd.f32 %v2331_v47, %v2329_v12  ;;  %v2099_v15 = vpack.c.bf16 %v2331_v47, %v2329_v12  ;;  %v1165_v12 = vmax.f32 %v1161_v17, %v1164_v59  ;;  %v345_v47 = vld [vmem:[%s2818_s11 + $0x2b0] sm:$0xff]  ;;  %v4647_v59 = vld [vmem:[#allocation29_spill] sm:$0xff] }
 0x263   : > { %v2335_v40 = vpop.eup %2334  ;;  %2354 = vpow2.f32 %v3469_v9  ;;  %v1626_v7 = vadd.f32 %v3627_v35, %v1625_v48  ;;  %v4641_v53 = vpack.c.bf16 %v3437_v29, %v3420_v20  ;;  %v3815_v48 = vadd.f32 %v3686_v25, %v339_v28 }
 0x264   : > { %v2337_v57 = vpop.eup %2336  ;;  %2356 = vpow2.f32 %v3476_v23  ;;  %v1651_v33 = vadd.f32 %v2333_v52, %v1650_v19  ;;  %2100 = vmatprep.subr.bf16.mxu1 %v2099_v15  ;;  %v2103_v4 = vpack.c.bf16 %v2335_v40, %v2333_v52  ;;  %v4643_v15 = vld [vmem:[#allocation24_spill] sm:$0xff]  ;;  %v3828_v25 = vadd.f32 %v3705_v51, %v345_v47 }
 0x265   : > { %v2339_v60 = vpop.eup %2338  ;;  %2358 = vpow2.f32 %v3481_v31  ;;  %v1627_v9 = vadd.f32 %v3634_v37, %v1626_v7  ;;  %2102 = vmatpush1.bf16.msra.mxu1 %v4641_v53  ;;  %4642 = vst [vmem:[#allocation47_spill] sm:$0xff] %v3815_v48  ;;  %v3821_v31 = vadd.f32 %v3693_v21, %v348_v18  ;;  %v4645_v7 = vld [vmem:[#allocation27_spill] sm:$0xff]  ;;  %v1162_v29 = vsel %vm1111_vm2, %v3815_v48, -inf }
 0x266   : > { %v2341_v19 = vpop.eup %2340  ;;  %2360 = vpow2.f32 %v4643_v15  ;;  %v1652_v17 = vadd.f32 %v2335_v40, %v1651_v33  ;;  %2104 = vmatprep.subr.bf16.mxu1 %v2103_v4  ;;  %v2107_v52 = vpack.c.bf16 %v2339_v60, %v2337_v57  ;;  %4646 = vst [vmem:[#allocation27_spill] sm:$0xff] %v3828_v25  ;;  %v1163_v21 = vmax.f32 %v1159_v56, %v1162_v29  ;;  %v4648_v4 = vld [vmem:[#allocation12_spill] sm:$0xff]  ;;  %v354_v15 = vld [vmem:[%s2818_s11 + $0x2f8] sm:$0xff] }
 0x267   : > { %4644 = vst [vmem:[#allocation24_spill] sm:$0xff] %v3821_v31  ;;  %v2343_v44 = vpop.eup %2342  ;;  %2362 = vpow2.f32 %v4645_v7  ;;  %v1628_v20 = vadd.f32 %v3647_v50, %v1627_v9  ;;  %v4649_v9 = vpack.c.bf16 %v3471_v38, %v3454_v24  ;;  %v1168_v51 = vsel %vm1111_vm2, %v3821_v31, -inf  ;;  %v4652_v31 = vld [vmem:[#allocation15_spill] sm:$0xff] }
 0x268   : > { %v2345_v28 = vpop.eup %2344  ;;  %2364 = vpow2.f32 %v4647_v59  ;;  %v1653_v40 = vadd.f32 %v2337_v57, %v1652_v17  ;;  %v2111_v33 = vpack.c.bf16 %v2343_v44, %v2341_v19  ;;  %v1166_v47 = vsel %vm1111_vm2, %v3828_v25, -inf  ;;  %v4650_v17 = vld [vmem:[#allocation13_spill] sm:$0xff] }
 0x269   : > { %v2347_v18 = vpop.eup %2346  ;;  %2366 = vpow2.f32 %v4648_v4  ;;  %v1629_v53 = vadd.f32 %v3657_v58, %v1628_v20  ;;  %2106 = vmatpush1.bf16.msra.mxu1 %v4649_v9  ;;  %v1169_v29 = vmax.f32 %v1165_v12, %v1168_v51  ;;  %v351_v20 = vld [vmem:[%s2818_s11 + $0x2e0] sm:$0xff]  ;;  %v1167_v38 = vmax.f32 %v1163_v21, %v1166_v47 }
 0x26a   : > { %v3841_v57 = vpop.eup %2348  ;;  %2368 = vpow2.f32 %v4650_v17  ;;  %v1654_v56 = vadd.f32 %v2339_v60, %v1653_v40  ;;  %2108 = vmatprep.subr.bf16.mxu1 %v2107_v52  ;;  %v2115_v7 = vpack.c.bf16 %v2347_v18, %v2345_v28  ;;  %v4651_v4 = vld [vmem:[#allocation14_spill] sm:$0xff]  ;;  %v2125_v9 = vpack.c.bf16 %v3614_v22, %v3606_v41  ;;  %v4653_v40 = vld [vmem:[#allocation16_spill] sm:$0xff]  ;;  %v4672_v22 = vld [vmem:[#allocation31_spill] sm:$0xff] }
 0x26b   : > { %v2351_v59 = vpop.eup %2350  ;;  %2370 = vpow2.f32 %v4651_v4  ;;  %v1630_v24 = vadd.f32 %v3668_v54, %v1629_v53  ;;  %v3854_v52 = vadd.f32 %v3715_v10, %v354_v15  ;;  %v4654_v51 = vld [vmem:[#allocation6_spill] sm:$0xff]  ;;  %v4655_v21 = vpack.c.bf16 %v3505_v39, %v3488_v8  ;;  %v4656_v10 = vld [vmem:[#allocation17_spill] sm:$0xff] }
 0x26c   : > { %v3849_v23 = vpop.eup %2352  ;;  %2372 = vpow2.f32 %v4652_v31  ;;  %v1655_v25 = vadd.f32 %v2341_v19, %v1654_v56  ;;  %v2119_v60 = vpack.c.bf16 %v2351_v59, %v3841_v57  ;;  %v3864_v47 = vadd.f32 %v3727_v42, %v351_v20  ;;  %v4657_v39 = vld [vmem:[#allocation18_spill] sm:$0xff] }
 0x26d   : > { %v3856_v12 = vpop.eup %2354  ;;  %2374 = vpow2.f32 %v4653_v40  ;;  %v1631_v53 = vadd.f32 %v4654_v51, %v1630_v24  ;;  %2110 = vmatpush1.bf16.msra.mxu1 %v4655_v21  ;;  %v2129_v19 = vpack.c.bf16 %v3634_v37, %v3627_v35  ;;  %v1172_v56 = vsel %vm1111_vm2, %v3854_v52, -inf  ;;  %v4682_v37 = vld [vmem:[#allocation10_spill] sm:$0xff] }
 0x26e   : > { %v3868_v31 = vpop.eup %2356  ;;  %2376 = vpow2.f32 %v4656_v10  ;;  %v1656_v15 = vadd.f32 %v2343_v44, %v1655_v25  ;;  %2112 = vmatprep.subr.bf16.mxu1 %v2111_v33  ;;  %v2123_v17 = vpack.c.bf16 %v3856_v12, %v3849_v23  ;;  %v1173_v20 = vmax.f32 %v1169_v29, %v1172_v56  ;;  %v4658_v44 = vld [vmem:[#allocation19_spill] sm:$0xff]  ;;  %v4659_v10 = vld [vmem:[#allocation20_spill] sm:$0xff]  ;;  %v4661_v56 = vld [vmem:[#allocation21_spill] sm:$0xff] }
 0x26f   : > { %v3875_v8 = vpop.eup %2358  ;;  %2378 = vpow2.f32 %v4657_v39  ;;  %v1632_v42 = vadd.f32 %v3688_v26, %v1631_v53  ;;  %v1170_v4 = vsel %vm1111_vm2, %v3864_v47, -inf  ;;  %v4660_v29 = vpack.c.bf16 %v3540_v1, %v3522_v27  ;;  %v4662_v27 = vld [vmem:[#allocation22_spill] sm:$0xff] }
 0x270   : > { %v3881_v24 = vpop.eup %2360  ;;  %2380 = vpow2.f32 %v4658_v44  ;;  %v1657_v25 = vadd.f32 %v2345_v28, %v1656_v15  ;;  %v2127_v33 = vpack.c.bf16 %v3875_v8, %v3868_v31  ;;  %v1171_v40 = vmax.f32 %v1167_v38, %v1170_v4 }
 0x271   : > { %v3886_v21 = vpop.eup %2362  ;;  %2382 = vpow2.f32 %v4659_v10  ;;  %v1633_v39 = vadd.f32 %v3695_v55, %v1632_v42  ;;  %2114 = vmatpush1.bf16.msra.mxu1 %v4660_v29 }
 0x272   : > { %v3897_v15 = vpop.eup %2364  ;;  %2384 = vpow2.f32 %v4661_v56  ;;  %v1658_v38 = vadd.f32 %v2347_v18, %v1657_v25  ;;  %2116 = vmatprep.subr.bf16.mxu1 %v2115_v7  ;;  %v1174_v4 = vmax.f32 %v1171_v40, %v1173_v20  ;;  %v4663_v18 = vld [vmem:[#allocation25_spill] sm:$0xff]  ;;  %v4664_v56 = vpack.c.bf16 %v3573_v63, %v3557_v2  ;;  %v4665_v63 = vld [vmem:[#allocation8_spill] sm:$0xff] }
 0x273   : > { %v3902_v44 = vpop.eup %2366  ;;  %2386 = vpow2.f32 %v4662_v27  ;;  %v1634_v1 = vadd.f32 %v3707_v6, %v1633_v39  ;;  %v4666_v25 = vld [vmem:[#allocation5_spill] sm:$0xff]  ;;  %v4668_v2 = vpack.c.bf16 %v3593_v16, %v3584_v32 }
 0x274   : > { %v3910_v28 = vpop.eup %2368  ;;  %2388 = vpow2.f32 %v4663_v18  ;;  %v1659_v7 = vadd.f32 %v3841_v57, %v1658_v38  ;;  %v1175_v20 = vrot.slane %v1174_v4, 4  ;;  %v3939_v18 = vcombine.high %v4666_v25, %v4666_v25 }
 0x275   : > { %v3916_v40 = vpop.eup %2370  ;;  %v1635_v39 = vadd.f32 %v3717_v49, %v1634_v1  ;;  %2118 = vmatpush1.bf16.msra.mxu1 %v4664_v56 }
 0x276   : > { %v3928_v38 = vpop.eup %2372  ;;  %v1660_v29 = vadd.f32 %v2351_v59, %v1659_v7  ;;  %2120 = vmatprep.subr.bf16.mxu1 %v2119_v60  ;;  %v1176_v10 = vmax.f32 %v1174_v4, %v1175_v20  ;;  %4667 = vst [vmem:[#allocation29_spill] sm:$0xff] %v3939_v18  ;;  %1536 = vmatprep.mubr.f32.mxu1 %v3939_v18 }
 0x277   : > { %v3934_v56 = vpop.eup %2374  ;;  %v1636_v27 = vadd.f32 %v3729_v46, %v1635_v39 }
 0x278   : > { %v3941_v57 = vpop.eup %2376  ;;  %v1661_v59 = vadd.f32 %v3849_v23, %v1660_v29  ;;  %v1177_v60 = vrot.slane %v1176_v10, 2 }
 0x279   : > { %v3946_v7 = vpop.eup %2378  ;;  %v1637_v20 = vadd.f32 %v3737_v30, %v1636_v27  ;;  %2122 = vmatpush1.bf16.msra.mxu1 %v4668_v2 }
 0x27a   : > { %v3953_v39 = vpop.eup %2380  ;;  %v1662_v1 = vadd.f32 %v3856_v12, %v1661_v59  ;;  %2124 = vmatprep.subr.bf16.mxu1 %v2123_v17  ;;  %v1178_v23 = vmax.f32 %v1176_v10, %v1177_v60 }
 0x27b   : > { %v3958_v4 = vpop.eup %2382  ;;  %v1638_v53 = vadd.f32 %v3745_v36, %v1637_v20  ;;  %v4677_v20 = vld [vmem:[#allocation34_spill] sm:$0xff] }
 0x27c   : > { %v3961_v27 = vpop.eup %2384  ;;  %v1663_v16 = vadd.f32 %v3868_v31, %v1662_v1  ;;  %v1179_v32 = vrot.slane %v1178_v23, 1  ;;  %v4674_v31 = vld [vmem:[#allocation33_spill] sm:$0xff] }
 0x27d   : > { %v3966_v42 = vpop.eup %2386  ;;  %v1639_v12 = vadd.f32 %v3752_v61, %v1638_v53  ;;  %2126 = vmatpush1.bf16.msra.mxu1 %v2125_v9 }
 0x27e   : > { %4669 = vst [vmem:[#allocation12_spill] sm:$0xff] %v3966_v42  ;;  %v3972_v17 = vpop.eup %2388  ;;  %v1664_v10 = vadd.f32 %v3875_v8, %v1663_v16  ;;  %2128 = vmatprep.subr.bf16.mxu1 %v2127_v33  ;;  %v3978_v1 = vmax.f32 %v1178_v23, %v1179_v32  ;;  %v4673_v16 = vld [vmem:[#allocation30_spill] sm:$0xff]  ;;  %v4675_v23 = vld [vmem:[#allocation32_spill] sm:$0xff] }
 0x27f   : > { %4670 = vst [vmem:[#allocation13_spill] sm:$0xff] %v3972_v17  ;;  %v1640_v60 = vadd.f32 %v3763_v45, %v1639_v12  ;;  %v4676_v12 = vld [vmem:[#allocation35_spill] sm:$0xff]  ;;  %v4696_v17 = vld [vmem:[#allocation24_spill] sm:$0xff] }
 0x280   : > { %v1665_v41 = vadd.f32 %v3881_v24, %v1664_v10  ;;  %v1183_v9 = vsub.f32 %v4672_v22, %v3978_v1  ;;  %v1186_v2 = vsub.f32 %v4673_v16, %v3978_v1  ;;  %v1189_v8 = vsub.f32 %v4674_v31, %v3978_v1  ;;  %v4678_v16 = vld [vmem:[#allocation39_spill] sm:$0xff] }
 0x281   : > { %v1641_v33 = vadd.f32 %v3770_v5, %v1640_v60  ;;  %v1192_v32 = vsub.f32 %v4675_v23, %v3978_v1  ;;  %v1195_v59 = vsub.f32 %v4676_v12, %v3978_v1  ;;  %v1198_v10 = vsub.f32 %v4677_v20, %v3978_v1  ;;  %2130 = vmatpush1.bf16.msra.mxu1 %v2129_v19  ;;  %v4679_v60 = vld [vmem:[#allocation38_spill] sm:$0xff]  ;;  %v4680_v23 = vld [vmem:[#allocation11_spill] sm:$0xff]  ;;  %v4683_v19 = vld [vmem:[#allocation28_spill] sm:$0xff] }
 0x282   : > { %v1666_v22 = vadd.f32 %v3886_v21, %v1665_v41  ;;  %v1201_v31 = vsub.f32 %v4678_v16, %v3978_v1  ;;  %v1204_v29 = vsub.f32 %v4679_v60, %v3978_v1  ;;  %v1207_v18 = vsub.f32 %v4680_v23, %v3978_v1  ;;  %v4684_v16 = vld [vmem:[#allocation26_spill] sm:$0xff]  ;;  %v4685_v23 = vld [vmem:[#allocation37_spill] sm:$0xff]  ;;  %v4689_v45 = vld [vmem:[#allocation7_spill] sm:$0xff] }
 0x283   : > { %v4681_v12 = vpack.c.bf16 %v3886_v21, %v3881_v24  ;;  %v4013_v20 = vadd.f32 %v3781_v0, %v1641_v33  ;;  %v1210_v35 = vsub.f32 %v4682_v37, %v3978_v1  ;;  %v1213_v41 = vsub.f32 %v4683_v19, %v3978_v1  ;;  %v4686_v24 = vld [vmem:[#allocation36_spill] sm:$0xff]  ;;  %v4687_v33 = vld [vmem:[#allocation41_spill] sm:$0xff]  ;;  %v4690_v5 = vld [vmem:[#allocation42_spill] sm:$0xff] }
 0x284   : > { %v1216_v25 = vsub.f32 %v4684_v16, %v3978_v1  ;;  %v1667_v60 = vadd.f32 %v3897_v15, %v1666_v22  ;;  %v1219_v53 = vsub.f32 %v4685_v23, %v3978_v1  ;;  %v1222_v21 = vsub.f32 %v4686_v24, %v3978_v1  ;;  %v4688_v0 = vld [vmem:[#allocation40_spill] sm:$0xff]  ;;  %v4691_v22 = vld [vmem:[#allocation43_spill] sm:$0xff] }
 0x285   : > { %2132 = vmatprep.subr.bf16.mxu1 %v4681_v12  ;;  %v1225_v12 = vsub.f32 %v4687_v33, %v3978_v1  ;;  %v4692_v23 = vpack.c.bf16 %v3657_v58, %v3647_v50  ;;  %v4693_v33 = vld [vmem:[#allocation9_spill] sm:$0xff]  ;;  %v4694_v16 = vpack.c.bf16 %v3902_v44, %v3897_v15  ;;  %v1281_v37 = vmul.f32 1.442695, %v1183_v9 }
 0x286   : > { %v1668_v24 = vadd.f32 %v3902_v44, %v1667_v60  ;;  %v4695_v44 = vld [vmem:[#allocation27_spill] sm:$0xff]  ;;  %v1287_v42 = vmul.f32 1.442695, %v1186_v2  ;;  %v1293_v60 = vmul.f32 1.442695, %v1189_v8  ;;  %v4698_v15 = vpack.c.bf16 %v3916_v40, %v3910_v28 }
 0x287   : > { %2134 = vmatpush1.bf16.msra.mxu1 %v4692_v23  ;;  %v1299_v48 = vmul.f32 1.442695, %v1192_v32  ;;  %2390 = vpow2.f32 %v1281_v37  ;;  %v1311_v58 = vmul.f32 1.442695, %v1198_v10  ;;  %v1317_v2 = vmul.f32 1.442695, %v1201_v31 }
 0x288   : > { %2136 = vmatprep.subr.bf16.mxu1 %v4694_v16  ;;  %v1669_v23 = vadd.f32 %v3910_v28, %v1668_v24  ;;  %v4697_v24 = vpack.c.bf16 %v4654_v51, %v3668_v54  ;;  %v1305_v16 = vmul.f32 1.442695, %v1195_v59  ;;  %2392 = vpow2.f32 %v1287_v42 }
 0x289   : > { %2394 = vpow2.f32 %v1293_v60  ;;  %v4699_v54 = vpack.c.bf16 %v3695_v55, %v3688_v26  ;;  %v1323_v9 = vmul.f32 1.442695, %v1204_v29  ;;  %v4700_v28 = vpack.c.bf16 %v3934_v56, %v3928_v38 }
 0x28a   : > { %v1670_v19 = vadd.f32 %v3916_v40, %v1669_v23  ;;  %2396 = vpow2.f32 %v1299_v48  ;;  %v1329_v40 = vmul.f32 1.442695, %v1207_v18  ;;  %v1335_v42 = vmul.f32 1.442695, %v1210_v35 }
 0x28b   : > { %2138 = vmatpush1.bf16.msra.mxu1 %v4697_v24  ;;  %2398 = vpow2.f32 %v1305_v16  ;;  %v1341_v8 = vmul.f32 1.442695, %v1213_v41  ;;  %v4701_v55 = vpack.c.bf16 %v3717_v49, %v3707_v6  ;;  %v1347_v48 = vmul.f32 1.442695, %v1216_v25  ;;  %v4710_v16 = vld [vmem:[#allocation12_spill] sm:$0xff] }
 0x28c   : > { %2140 = vmatprep.subr.bf16.mxu1 %v4698_v15  ;;  %v1671_v50 = vadd.f32 %v3928_v38, %v1670_v19  ;;  %2400 = vpow2.f32 %v1311_v58  ;;  %v4702_v38 = vpack.c.bf16 %v3946_v7, %v3941_v57  ;;  %v1353_v18 = vmul.f32 1.442695, %v1219_v53 }
 0x28d   : > { %2402 = vpow2.f32 %v1317_v2  ;;  %v1359_v29 = vmul.f32 1.442695, %v1222_v21  ;;  %v1365_v10 = vmul.f32 1.442695, %v1225_v12  ;;  %v1276_v49 = vsub.f32 %v3854_v52, %v3978_v1 }
 0x28e   : > { %v1672_v51 = vadd.f32 %v3934_v56, %v1671_v50  ;;  %2404 = vpow2.f32 %v1323_v9  ;;  %v4703_v6 = vpack.c.bf16 %v3737_v30, %v3729_v46  ;;  %v4101_v25 = vadd.f32 %v4665_v63, %v4013_v20 }
 0x28f   : > { %2142 = vmatpush1.bf16.msra.mxu1 %v4699_v54  ;;  %2406 = vpow2.f32 %v1329_v40  ;;  %v4704_v53 = vsub.f32 %v4688_v0, %v3978_v1  ;;  %v4705_v30 = vpack.c.bf16 %v3958_v4, %v3953_v39  ;;  %v4706_v20 = vsub.f32 %v4689_v45, %v3978_v1 }
 0x290   : > { %2144 = vmatprep.subr.bf16.mxu1 %v4700_v28  ;;  %v1673_v59 = vadd.f32 %v3941_v57, %v1672_v51  ;;  %2408 = vpow2.f32 %v1335_v42  ;;  %v4708_v45 = vsub.f32 %v4691_v22, %v3978_v1  ;;  %v4709_v23 = vpack.c.bf16 %v3752_v61, %v3745_v36 }
 0x291   : > { %v4092_v32 = vpop.eup %2390  ;;  %2410 = vpow2.f32 %v1341_v8  ;;  %v1371_v31 = vmul.f32 1.442695, %v4704_v53  ;;  %v1377_v41 = vmul.f32 1.442695, %v4706_v20  ;;  %v4711_v2 = vsub.f32 %v4693_v33, %v3978_v1 }
 0x292   : > { %v1674_v26 = vadd.f32 %v3946_v7, %v1673_v59  ;;  %v4103_v57 = vpop.eup %2392  ;;  %2412 = vpow2.f32 %v1347_v48  ;;  %v1687_v35 = vsel %vm1111_vm2, %v4092_v32, 0.0  ;;  %v1389_v58 = vmul.f32 1.442695, %v4708_v45  ;;  %v4714_v59 = vld [vmem:[#allocation13_spill] sm:$0xff] }
 0x293   : > { %2146 = vmatpush1.bf16.msra.mxu1 %v4701_v55  ;;  %v4114_v46 = vpop.eup %2394  ;;  %2414 = vpow2.f32 %v1353_v18  ;;  %v1688_v21 = vsel %vm1111_vm2, %v4103_v57, 0.0  ;;  %v2165_v0 = vpack.c.bf16 %v4103_v57, %v4092_v32  ;;  %v1395_v22 = vmul.f32 1.442695, %v4711_v2  ;;  %v4717_v18 = vld [vmem:[#allocation45_spill] sm:$0xff] }
 0x294   : > { %2148 = vmatprep.subr.bf16.mxu1 %v4702_v38  ;;  %v1675_v56 = vadd.f32 %v3953_v39, %v1674_v26  ;;  %v4123_v12 = vpop.eup %2396  ;;  %2416 = vpow2.f32 %v1359_v29  ;;  %v1689_v19 = vadd.f32 %v1688_v21, %v1687_v35  ;;  %v1690_v60 = vsel %vm1111_vm2, %v4114_v46, 0.0 }
 0x295   : > { %v4129_v50 = vpop.eup %2398  ;;  %2418 = vpow2.f32 %v1365_v10  ;;  %v2169_v15 = vpack.c.bf16 %v4123_v12, %v4114_v46  ;;  %v4712_v51 = vpack.c.bf16 %v4710_v16, %v3961_v27  ;;  %v4713_v36 = vsub.f32 %v3743_v62, %v3978_v1 }
 0x296   : > { %v1676_v7 = vadd.f32 %v3958_v4, %v1675_v56  ;;  %v4707_v4 = vsub.f32 %v4690_v5, %v3978_v1  ;;  %v4141_v5 = vpop.eup %2400  ;;  %2420 = vpow2.f32 %v1371_v31  ;;  %v1691_v54 = vadd.f32 %v1690_v60, %v1689_v19  ;;  %v4718_v56 = vld [vmem:[#allocation44_spill] sm:$0xff] }
 0x297   : > { %2150 = vmatpush1.bf16.msra.mxu1 %v4703_v6  ;;  %v4150_v9 = vpop.eup %2402  ;;  %2422 = vpow2.f32 %v1377_v41  ;;  %v1401_v61 = vmul.f32 1.442695, %v4713_v36  ;;  %v1692_v28 = vsel %vm1111_vm2, %v4123_v12, 0.0  ;;  %v2173_v40 = vpack.c.bf16 %v4141_v5, %v4129_v50 }
 0x298   : > { %2152 = vmatprep.subr.bf16.mxu1 %v4705_v30  ;;  %v1677_v37 = vadd.f32 %v3961_v27, %v1676_v7  ;;  %v1383_v39 = vmul.f32 1.442695, %v4707_v4  ;;  %v4159_v33 = vpop.eup %2404  ;;  %v4715_v27 = vsub.f32 %v3725_v43, %v3978_v1  ;;  %v1693_v55 = vadd.f32 %v1692_v28, %v1691_v54 }
 0x299   : > { %v4165_v26 = vpop.eup %2406  ;;  %v4716_v62 = vsub.f32 %v3761_v13, %v3978_v1  ;;  %v1694_v38 = vsel %vm1111_vm2, %v4129_v50, 0.0  ;;  %v4719_v29 = vpack.c.bf16 %v4717_v18, %v4718_v56  ;;  %v2177_v10 = vpack.c.bf16 %v4159_v33, %v4150_v9  ;;  %v4721_v13 = vld [vmem:[#allocation23_spill] sm:$0xff]  ;;  %v4734_v56 = vld [vmem:[#allocation29_spill] sm:$0xff] }
 0x29a   : > { %v1678_v24 = vadd.f32 %v4710_v16, %v1677_v37  ;;  %2424 = vpow2.f32 %v1383_v39  ;;  %v1407_v8 = vmul.f32 1.442695, %v4715_v27  ;;  %v4177_v43 = vpop.eup %2408  ;;  %v4720_v6 = vsub.f32 %v3758_v3, %v3978_v1  ;;  %v4727_v16 = vld [vmem:[#allocation46_spill] sm:$0xff] }
 0x29b   : > { %2154 = vmatpush1.bf16.msra.mxu1 %v4709_v23  ;;  %2426 = vpow2.f32 %v1389_v58  ;;  %v1413_v48 = vmul.f32 1.442695, %v4716_v62  ;;  %v1695_v53 = vadd.f32 %v1694_v38, %v1693_v55  ;;  %v4722_v31 = vpack.c.bf16 %v4721_v13, %v4714_v59  ;;  %v4188_v30 = vpop.eup %2410  ;;  %v4725_v58 = vld [vmem:[#allocation47_spill] sm:$0xff]  ;;  %v4732_v55 = vld [vmem:[#allocation5_spill] sm:$0xff] }
 0x29c   : > { %2156 = vmatprep.subr.bf16.mxu1 %v4712_v51  ;;  %v1679_v42 = vadd.f32 %v4714_v59, %v1678_v24  ;;  %2428 = vpow2.f32 %v1395_v22  ;;  %v1419_v7 = vmul.f32 1.442695, %v4720_v6  ;;  %v4723_v20 = vsub.f32 %v3789_v11, %v3978_v1  ;;  %v4197_v37 = vpop.eup %2412 }
 0x29d   : > { %2430 = vpow2.f32 %v1401_v61  ;;  %v1696_v21 = vsel %vm1111_vm2, %v4141_v5, 0.0  ;;  %v2181_v3 = vpack.c.bf16 %v4177_v43, %v4165_v26  ;;  %v4724_v4 = vsub.f32 %v3778_v14, %v3978_v1  ;;  %v4202_v45 = vpop.eup %2414 }
 0x29e   : > { %v4186_v35 = vadd.f32 %v4721_v13, %v1679_v42  ;;  %v1425_v41 = vmul.f32 1.442695, %v4723_v20  ;;  %2432 = vpow2.f32 %v1407_v8  ;;  %v1697_v19 = vadd.f32 %v1696_v21, %v1695_v53  ;;  %v4214_v14 = vpop.eup %2416 }
 0x29f   : > { %2158 = vmatpush1.bf16.msra.mxu1 %v4719_v29  ;;  %v1431_v39 = vmul.f32 1.442695, %v4724_v4  ;;  %2434 = vpow2.f32 %v1413_v48  ;;  %v4726_v11 = vsub.f32 %v4725_v58, %v3978_v1  ;;  %v1698_v23 = vsel %vm1111_vm2, %v4150_v9, 0.0  ;;  %v4219_v36 = vpop.eup %2418 }
 0x2a0   : > { %2160 = vmatprep.subr.bf16.mxu1 %v4722_v31  ;;  %v4728_v24 = vpack.c.bf16 %v4665_v63, %v4727_v16  ;;  %v2185_v2 = vpack.c.bf16 %v4197_v37, %v4188_v30  ;;  %2436 = vpow2.f32 %v1419_v7  ;;  %v4729_v22 = vsub.f32 %v3796_v34, %v3978_v1  ;;  %v4228_v42 = vpop.eup %2420 }
 0x2a1   : > { %v1437_v60 = vmul.f32 1.442695, %v4726_v11  ;;  %v1699_v51 = vadd.f32 %v1698_v23, %v1697_v19  ;;  %2438 = vpow2.f32 %v1425_v41  ;;  %v4730_v61 = vsub.f32 %v4695_v44, %v3978_v1  ;;  %v2423_v62 = vpop.eup %2422 }
 0x2a2   : > { %v1443_v54 = vmul.f32 1.442695, %v4729_v22  ;;  %v1700_v63 = vsel %vm1111_vm2, %v4159_v33, 0.0  ;;  %v2189_v59 = vpack.c.bf16 %v4214_v14, %v4202_v45  ;;  %2440 = vpow2.f32 %v1431_v39 }
 0x2a3   : > { %2162 = vmatpush1.bf16.msra.mxu1 %v4728_v24  ;;  %v1449_v28 = vmul.f32 1.442695, %v4730_v61  ;;  %v4731_v34 = vsub.f32 %v4696_v17, %v3978_v1  ;;  %v1701_v8 = vadd.f32 %v1700_v63, %v1699_v51  ;;  %2442 = vpow2.f32 %v1437_v60 }
 0x2a4   : > { %v4733_v44 = vsub.f32 %v3864_v47, %v3978_v1  ;;  %v1702_v38 = vsel %vm1111_vm2, %v4165_v26, 0.0  ;;  %v2193_v18 = vpack.c.bf16 %v4228_v42, %v4219_v36  ;;  %v2425_v29 = vpop.eup %2424  ;;  %2444 = vpow2.f32 %v1443_v54 }
 0x2a5   : > { %v1455_v27 = vmul.f32 1.442695, %v4731_v34  ;;  %v1703_v17 = vadd.f32 %v1702_v38, %v1701_v8  ;;  %v1467_v6 = vmul.f32 1.442695, %v1276_v49  ;;  %v2427_v7 = vpop.eup %2426  ;;  %2446 = vpow2.f32 %v1449_v28 }
 0x2a6   : > { %1537 = vmatmul.mubr.f32.vlgmr.msra.gmra.mrb[38].mxu1 %v4732_v55  ;;  %v1461_v48 = vmul.f32 1.442695, %v4733_v44  ;;  %v1704_v47 = vsel %vm1111_vm2, %v4177_v43, 0.0  ;;  %v2163_v53 = vpack.c.bf16 %v2425_v29, %v2423_v62  ;;  %v2429_v13 = vpop.eup %2428  ;;  %v1706_v41 = vsel %vm1111_vm2, %v4188_v30, 0.0 }
 0x2a7   : > { %1607 = vmatprep.mubr.f32.mxu1 %v4734_v56  ;;  %2448 = vpow2.f32 %v1455_v27  ;;  %v1705_v31 = vadd.f32 %v1704_v47, %v1703_v17  ;;  %v2431_v20 = vpop.eup %2430  ;;  %v2167_v21 = vpack.c.bf16 %v2429_v13, %v2427_v7  ;;  %v1708_v1 = vsel %vm1111_vm2, %v4197_v37, 0.0 }
 0x2a8   : > { %2450 = vpow2.f32 %v1461_v48  ;;  %2164 = vmatprep.subr.bf16.mxu1 %v2163_v53  ;;  %v2433_v4 = vpop.eup %2432  ;;  %v1710_v60 = vsel %vm1111_vm2, %v4202_v45, 0.0  ;;  %v1712_v57 = vsel %vm1111_vm2, %v4214_v14, 0.0  ;;  %v1714_v61 = vsel %vm1111_vm2, %v4219_v36, 0.0 }
 0x2a9   : > { %v1707_v39 = vadd.f32 %v1706_v41, %v1705_v31  ;;  %2452 = vpow2.f32 %v1467_v6  ;;  %2166 = vmatpush3.bf16.msra.mxu1 %v2165_v0  ;;  %v2435_v52 = vpop.eup %2434  ;;  %v2171_v49 = vpack.c.bf16 %v2433_v4, %v2431_v20  ;;  %v1716_v12 = vsel %vm1111_vm2, %v4228_v42, 0.0 }
 0x2aa   : > { %2168 = vmatprep.subr.bf16.mxu1 %v2167_v21  ;;  %v2437_v19 = vpop.eup %2436  ;;  %v1718_v44 = vsel %vm1111_vm2, %v2423_v62, 0.0  ;;  %v1720_v56 = vsel %vm1111_vm2, %v2425_v29, 0.0  ;;  %v1722_v5 = vsel %vm1111_vm2, %v2427_v7, 0.0  ;;  %v1724_v17 = vsel %vm1111_vm2, %v2429_v13, 0.0 }
 0x2ab   : > { %v1709_v58 = vadd.f32 %v1708_v1, %v1707_v39  ;;  %v2439_v11 = vpop.eup %2438  ;;  %v2175_v23 = vpack.c.bf16 %v2437_v19, %v2435_v52  ;;  %v1726_v6 = vsel %vm1111_vm2, %v2431_v20, 0.0  ;;  %v1728_v9 = vsel %vm1111_vm2, %v2433_v4, 0.0 }
 0x2ac   : > { %v2441_v16 = vpop.eup %2440  ;;  %v1732_v26 = vsel %vm1111_vm2, %v2437_v19, 0.0  ;;  %v1644_v21 = vrot.slane %v4101_v25, 4 }
 0x2ad   : > { %v1711_v24 = vadd.f32 %v1710_v60, %v1709_v58  ;;  %2170 = vmatpush3.bf16.msra.mxu1 %v2169_v15  ;;  %v2443_v32 = vpop.eup %2442  ;;  %v2179_v0 = vpack.c.bf16 %v2441_v16, %v2439_v11  ;;  %v1736_v30 = vsel %vm1111_vm2, %v2441_v16, 0.0 }
 0x2ae   : > { %2172 = vmatprep.subr.bf16.mxu1 %v2171_v49  ;;  %v2445_v22 = vpop.eup %2444  ;;  %v1645_v4 = vadd.f32 %v1644_v21, %v4101_v25 }
 0x2af   : > { %v1713_v54 = vadd.f32 %v1712_v57, %v1711_v24  ;;  %v2447_v51 = vpop.eup %2446  ;;  %v2183_v28 = vpack.c.bf16 %v2445_v22, %v2443_v32  ;;  %v1740_v14 = vsel %vm1111_vm2, %v2445_v22, 0.0 }
 0x2b0   : > { %v1742_v53 = vsel %vm1111_vm2, %v2447_v51, 0.0 }
 0x2b1   : > { %v2449_v63 = vpop.eup %2448  ;;  %v1715_v34 = vadd.f32 %v1714_v61, %v1713_v54  ;;  %2174 = vmatpush3.bf16.msra.mxu1 %v2173_v40 }
 0x2b2   : > { %v2451_v46 = vpop.eup %2450  ;;  %2176 = vmatprep.subr.bf16.mxu1 %v2175_v23  ;;  %v2187_v15 = vpack.c.bf16 %v2449_v63, %v2447_v51  ;;  %v1744_v31 = vsel %vm1111_vm2, %v2449_v63, 0.0 }
 0x2b3   : > { %v2453_v27 = vpop.eup %2452  ;;  %v1717_v8 = vadd.f32 %v1716_v12, %v1715_v34  ;;  %v1746_v36 = vsel %vm1111_vm2, %v2451_v46, 0.0 }
 0x2b4   : > { %v2191_v48 = vpack.c.bf16 %v2453_v27, %v2451_v46 }
 0x2b5   : > { %v1719_v38 = vadd.f32 %v1718_v44, %v1717_v8  ;;  %2178 = vmatpush3.bf16.msra.mxu1 %v2177_v10  ;;  %v1730_v10 = vsel %vm1111_vm2, %v2435_v52, 0.0  ;;  %v1646_v52 = vrot.slane %v1645_v4, 2 }
 0x2b6   : > { %2180 = vmatprep.subr.bf16.mxu1 %v2179_v0 }
 0x2b7   : > { %v1721_v50 = vadd.f32 %v1720_v56, %v1719_v38  ;;  %v1647_v49 = vadd.f32 %v1646_v52, %v1645_v4 }
 0x2b9   : > { %v1723_v40 = vadd.f32 %v1722_v5, %v1721_v50  ;;  %2182 = vmatpush3.bf16.msra.mxu1 %v2181_v3  ;;  %v1734_v3 = vsel %vm1111_vm2, %v2439_v11, 0.0  ;;  %v1648_v58 = vrot.slane %v1647_v49, 1 }
 0x2ba   : > { %2184 = vmatprep.subr.bf16.mxu1 %v2183_v28 }
 0x2bb   : > { %v1725_v62 = vadd.f32 %v1724_v17, %v1723_v40  ;;  %v1649_v60 = vadd.f32 %v1648_v58, %v1647_v49 }
 0x2bd   : > { %v1727_v47 = vadd.f32 %v1726_v6, %v1725_v62  ;;  %2186 = vmatpush3.bf16.msra.mxu1 %v2185_v2  ;;  %v1738_v2 = vsel %vm1111_vm2, %v2443_v32, 0.0  ;;  %2454 = vrcp.f32 %v1649_v60 }
 0x2be   : > { %2188 = vmatprep.subr.bf16.mxu1 %v2187_v15 }
 0x2bf   : > { %v1729_v33 = vadd.f32 %v1728_v9, %v1727_v47 }
 0x2c1   : > { %v1731_v29 = vadd.f32 %v1730_v10, %v1729_v33  ;;  %2190 = vmatpush3.bf16.msra.mxu1 %v2189_v59 }
 0x2c2   : > { %2192 = vmatprep.subr.bf16.mxu1 %v2191_v48 }
 0x2c3   : > { %v1733_v43 = vadd.f32 %v1732_v26, %v1731_v29 }
 0x2c5   : > { %v1735_v7 = vadd.f32 %v1734_v3, %v1733_v43  ;;  %2194 = vmatpush3.bf16.msra.mxu1 %v2193_v18  ;;  %v1748_v18 = vsel %vm1111_vm2, %v2453_v27, 0.0 }
 0x2c7   : > { %v1737_v37 = vadd.f32 %v1736_v30, %v1735_v7  ;;  %v2455_v16 = vpop.eup %2454 }
 0x2c8   : > { %1608 = vmatmul.mubr.f32.vlgmr.msra.gmra.mrb[40].mxu1 %v4732_v55  ;;  %v1681_v55 = vrot.slane %v4186_v35, 4  ;;  %v1759_v32 = vmul.f32 %v2455_v16, %v1649_v60 }
 0x2c9   : > { %v1739_v45 = vadd.f32 %v1738_v2, %v1737_v37 }
 0x2ca   : > { %v1682_v39 = vadd.f32 %v1681_v55, %v4186_v35  ;;  %v1762_v25 = vsub.f32 2.0, %v1759_v32 }
 0x2cb   : > { %v1741_v59 = vadd.f32 %v1740_v14, %v1739_v45 }
 0x2cc   : > { %v1683_v1 = vrot.slane %v1682_v39, 2  ;;  %v1765_v54 = vmul.f32 %v2455_v16, %v1762_v25 }
 0x2cd   : > { %v1743_v13 = vadd.f32 %v1742_v53, %v1741_v59 }
 0x2ce   : > { %v1684_v19 = vadd.f32 %v1683_v1, %v1682_v39 }
 0x2cf   : > { %v1745_v20 = vadd.f32 %v1744_v31, %v1743_v13 }
 0x2d0   : > { %v1685_v11 = vrot.slane %v1684_v19, 1 }
 0x2d1   : > { %v1747_v42 = vadd.f32 %v1746_v36, %v1745_v20 }
 0x2d2   : > { %v1686_v23 = vadd.f32 %v1685_v11, %v1684_v19 }
 0x2d3   : > { %v1749_v41 = vadd.f32 %v1748_v18, %v1747_v42 }
 0x2d4   : > { %2456 = vrcp.f32 %v1686_v23 }
 0x2d5   : > { %v1750_v0 = vrot.slane %v1749_v41, 4 }
 0x2d7   : > { %v1751_v22 = vadd.f32 %v1750_v0, %v1749_v41 }
 0x2d9   : > { %v1752_v46 = vrot.slane %v1751_v22, 2 }
 0x2db   : > { %v1753_v15 = vadd.f32 %v1752_v46, %v1751_v22 }
 0x2dd   : > { %v1754_v27 = vrot.slane %v1753_v15, 1 }
 0x2de   : > { %v2457_v24 = vpop.eup %2456 }
 0x2df   : > { %v1760_v57 = vmul.f32 %v2457_v24, %v1686_v23  ;;  %v1755_v8 = vadd.f32 %v1754_v27, %v1753_v15 }
 0x2e1   : > { %v1763_v35 = vsub.f32 2.0, %v1760_v57  ;;  %2458 = vrcp.f32 %v1755_v8 }
 0x2e3   : > { %v1766_v61 = vmul.f32 %v2457_v24, %v1763_v35 }
 0x2eb   : > { %v2459_v44 = vpop.eup %2458 }
 0x2ec   : > { %v1761_v48 = vmul.f32 %v2459_v44, %v1755_v8 }
 0x2ee   : > { %v1764_v38 = vsub.f32 2.0, %v1761_v48 }
 0x2f0   : > { %v1767_v40 = vmul.f32 %v2459_v44, %v1764_v38 }
 0x379   : > { %v1538_v51 = vpop.f32.mrb[38].mxu1 }
 0x37a   : > { %v1768_v28 = vmul.f32 %v1765_v54, %v1538_v51  ;;  %v1540_v63 = vpop.f32.mrb[39].mxu1 }
 0x37b   : > { %v1769_v34 = vmul.f32 %v1766_v61, %v1540_v63 }
 0x37d   : > { %v1773_v12 = vcombine.low %v1768_v28, %v1769_v34 }
 0x37f   : > { %1775 = vst [vmem:[%s229_s21] sm:$0xff] %v1773_v12 }
 0x39b   : > { %v2046_v56 = vpop.f32.mrb[40].mxu1 }
 0x39c   : > { %v2047_v50 = vpop.f32.mrb[41].mxu1 }
 0x39d   : > { %v2048_v5 = vadd.f32 %v2047_v50, %v2046_v56 }
 0x39f   : > { %v1770_v17 = vmul.f32 %v2048_v5, %v1767_v40 }
 0x3a1   : > { %1777 = vst.msk [vmem:[%s229_s21 + $0x8] sm:$0xf] %vm1776_vm3, %v1770_v17 }
 0x3a2   : > { %2473 = shalt.err (!%p2470_p5)
}
 0x3a3   : > { %s2474_s7 = scalar_lea.hbm %s4311_s29, 192  ;;  %s2478_s10 = scalar_lea.hbm %s4363_s3, 384 }
 0x3a4   : > { %p2475_p6 = scmp.ne.s32.totalorder %s4311_s29, %s2474_s7  ;;  %p2479_p10 = scmp.lt.u32.totalorder %s4311_s29, %s4363_s3 }
 0x3a5   : > { %p2480_p11 = scmp.lt.u32.totalorder %s2478_s10, %s2474_s7  ;;  %p2482_p13 = scmp.lt.u32.totalorder %s2474_s7, %s4311_s29 }
 0x3a6   : > { %p2476_p7 = pnand %p2475_p6, %p2602_p4 }
 0x3a7   : > { %p2481_p12 = por %p2480_p11, %p2479_p10 }
 0x3a8   : > { %p2477_p9 = pneg %p2476_p7 }
 0x3a9   : > { %p2483_p0 = por %p2482_p13, %p2481_p12 }
 0x3ab   : > { %p2484_p1 = pnand %p2483_p0, %p2477_p9 }
 0x3ad   : > { %2487 = shalt.err (!%p2484_p1)
}
 0x3ae   : > { %2201 = dma.vmem_to_hbm [thread:$0]  (%p2602_p4), %s4313_s26, 192, %s4311_s29, %s1779_s30  }
 0x3af PF: > { %p2207_p2 = scmp.ge.s32.totalorder %s2538_s17, 2  ;;  %s1807_s19 = sand.u32 1, %s2518_s12  }
 0x3b0   : > { %s1808_s21 = scalar_lea.sflag [#allocation3], %s1807_s19 }
 0x3b1   : > { %p2204_p3 = pnand %p2207_p2, %p2609_p8 }
 0x3b3   : > { %2513 = dma.done.wait (!%p2204_p3), %s1808_s21, 192  }
 0x3b4   : > { %2515 = vsyncadd (!%p2204_p3), %s1808_s21, 4294967104  ;;  %s16_s17 = sadd.s32 1, %s2538_s17   ;;  %s4735_s12 = smov %s2522_s13 }
 0x3b5   : > { %p13_p5 = scmp.ge.s32.totalorder %s16_s17, 4   ;;  %s4736_s13 = smov %s2526_s14 }
 0x3b6   : > { %s4737_s14 = smov %s2615_s25  ;;  %s4738_s15 = smov %s2534_s16 }
 0x3b7   : > { %s4739_s16 = smov %s4741_s20  ;;  %15 = sbr.rel (!%p13_p5) target bundleno = 4 (0x4), region = 73 }
 0x3be   :  { %1813 = vsyncpa [#allocation3], 1 }
 0x3bf   :  { %1815 = vsyncpa [#allocation3 + $0x1], 1 }

</bundles_post_ra>
